<compile_context>
chip_gen: v5e
topology: v5e:2x2
jax: 0.10.0
libtpu: 0.0.40
codegen_flags: <defaults>
</compile_context>

<pallas_src>
import math

import jax
import jax.numpy as jnp
from jax.experimental import pallas as pl
from jax.experimental.pallas import tpu as pltpu

LANE = 128  # TPU vreg lane width; the per-gate column stride is padded to this.


def mygru_kernel(x_ref,      # (T, B, I)   time-major inputs, f32
                 w_i_ref,    # (I, 3*Hp)   [W_ir^T | W_iz^T | W_in^T], lane-padded
                 b_i_ref,    # (1, 3*Hp)   [b_ir+b_hr | b_iz+b_hz | b_in], lane-padded
                 w_h_ref,    # (Hp, 3*Hp)  [W_hr^T | W_hz^T | W_hn^T], bf16, lane-padded
                 b_hn_ref,   # (1, Hp)     hidden bias of the "new" gate, lane-padded
                 fc_w_ref,   # (Hp, O)     FC head weight (transposed), zero-padded rows
                 fc_b_ref,   # (1, O)      FC head bias
                 out_ref,    # (B, O)      output
                 xp_scr):    # VMEM (T, B, 3*Hp) f32: precomputed input projections
    T, B, I = x_ref.shape
    Hp = w_h_ref.shape[0]

    # ---- fused, h-independent input projection: computed ONCE, kept in VMEM ----
    w_i = w_i_ref[...]
    b_i = b_i_ref[...]
    x = x_ref[...]
    if I == 1:
        # x_t @ W_i^T degenerates to a broadcast multiply when input_size == 1 (VPU).
        xp = x * w_i[None] + b_i[None]                              # (T, B, 3*Hp)
    else:
        xp = jnp.einsum("tbi,ij->tbj", x, w_i,
                        preferred_element_type=jnp.float32) + b_i[None]
    xp_scr[...] = xp

    # Resident hidden-gate weights for the whole recurrence (bf16 halves vregs).
    w_h = w_h_ref[...]                                              # (Hp, 3*Hp) bf16
    # Hoist the (1,Hp)->(B,Hp) broadcast out of the unrolled loop (JAX does not
    # CSE broadcast_in_dim; inside the loop it would be re-emitted every step).
    b_hn = jnp.broadcast_to(b_hn_ref[...], (B, Hp))                 # (B, Hp) f32

    def step(t, h):
        xp_t = xp_scr[t]                                            # (B, 3*Hp) f32
        # One fused MXU matmul for all three hidden gates; bf16 operands, f32 acc.
        gh = jnp.dot(h.astype(jnp.bfloat16), w_h,
                     preferred_element_type=jnp.float32)            # (B, 3*Hp)
        # All gate slices are 128-lane aligned (gate stride == Hp == 128).
        r = jax.nn.sigmoid(xp_t[:, 0:Hp] + gh[:, 0:Hp])
        z = jax.nn.sigmoid(xp_t[:, Hp:2 * Hp] + gh[:, Hp:2 * Hp])
        n = jnp.tanh(xp_t[:, 2 * Hp:] + r * (gh[:, 2 * Hp:] + b_hn))
        return (1.0 - z) * n + z * h

    h0 = jnp.zeros((B, Hp), jnp.float32)
    # Full unroll is fine at T=8; cap the unroll factor (e.g. unroll=8) if T grows
    # into the hundreds to bound code size and vreg pressure.
    h_last = jax.lax.fori_loop(0, T, step, h0, unroll=True)

    # ---- fused FC head epilogue: one tiny (B,Hp)x(Hp,O) matmul ----
    out = jnp.dot(h_last, fc_w_ref[...],
                  preferred_element_type=jnp.float32) + fc_b_ref[...]
    out_ref[...] = out.astype(out_ref.dtype)


def mygru_forward(x, params):
    """x: (B, T, I) float32 -> (B, O, 1) float32 (matches MYGRU.forward)."""
    B, T, I = x.shape
    Hp, threeHp = params["w_h_pad"].shape
    O = params["fc_w_pad"].shape[1]

    # Time-major layout for clean per-step reads inside the kernel.  This is a
    # tiny metadata-sized op; the projection and FC head themselves are fused
    # into the kernel below.
    x_tm = jnp.transpose(x, (1, 0, 2))                              # (T, B, I)

    out = pl.pallas_call(
        mygru_kernel,
        out_shape=jax.ShapeDtypeStruct((B, O), jnp.float32),
        grid_spec=pltpu.PrefetchScalarGridSpec(
            num_scalar_prefetch=0,
            # Single sequential invocation: the whole recurrence runs inside one
            # kernel body.  For batches large enough to matter, add a leading
            # "parallel" grid axis over batch tiles to use v7x's second TensorCore.
            grid=(1,),
            in_specs=[
                pl.BlockSpec((T, B, I), lambda i: (0, 0, 0)),
                pl.BlockSpec((I, threeHp), lambda i: (0, 0)),
                pl.BlockSpec((1, threeHp), lambda i: (0, 0)),
                pl.BlockSpec((Hp, threeHp), lambda i: (0, 0)),
                pl.BlockSpec((1, Hp), lambda i: (0, 0)),
                pl.BlockSpec((Hp, O), lambda i: (0, 0)),
                pl.BlockSpec((1, O), lambda i: (0, 0)),
            ],
            out_specs=pl.BlockSpec((B, O), lambda i: (0, 0)),
            scratch_shapes=[pltpu.VMEM((T, B, threeHp), jnp.float32)],
        ),
        compiler_params=pltpu.CompilerParams(
            # All buffers here are well under 1 MiB.  For large T, tile the
            # sequence into chunks (grid over T-chunks, h carried in a VMEM
            # scratch, chunk axis "arbitrary") or raise vmem_limit_bytes —
            # v7x has half the VMEM of v5e/v6e.
            dimension_semantics=("arbitrary",),
        ),
    )(x_tm, params["w_i_pad"], params["b_i_pad"], params["w_h_pad"],
      params["b_hn_pad"], params["fc_w_pad"], params["fc_b_pad"])

    return out[:, :, None]                                          # (B, O, 1)


def init_params(key, input_size=1, hidden_size=64, output_size=16):
    """PyTorch-style U(-1/sqrt(H), 1/sqrt(H)) init + lane-padded fused layouts."""
    H, I, O = hidden_size, input_size, output_size
    Hp = ((H + LANE - 1) // LANE) * LANE                            # gate stride -> 128
    k = 1.0 / math.sqrt(H)
    keys = jax.random.split(key, 6)

    # Raw PyTorch-layout parameters (gate order r | z | n).
    w_ih = jax.random.uniform(keys[0], (3 * H, I), jnp.float32, -k, k)
    w_hh = jax.random.uniform(keys[1], (3 * H, H), jnp.float32, -k, k)
    b_ih = jax.random.uniform(keys[2], (3 * H,), jnp.float32, -k, k)
    b_hh = jax.random.uniform(keys[3], (3 * H,), jnp.float32, -k, k)
    fc_w = jax.random.uniform(keys[4], (O, H), jnp.float32, -k, k)
    fc_b = jax.random.uniform(keys[5], (O,), jnp.float32, -k, k)

    def gate(v, g):
        return v[g * H:(g + 1) * H]

    # Lane-padded fused layouts: gate g lives in columns [g*Hp, g*Hp+H); all
    # padding is zero so the padded hidden lanes stay exactly zero through the
    # recurrence (z=0.5, n=0, h stays 0) and contribute nothing to the FC head.
    w_i_pad = jnp.zeros((I, 3 * Hp), jnp.float32)
    b_i_pad = jnp.zeros((1, 3 * Hp), jnp.float32)
    w_h_pad = jnp.zeros((Hp, 3 * Hp), jnp.float32)
    for g in range(3):
        w_i_pad = w_i_pad.at[:, g * Hp:g * Hp + H].set(gate(w_ih, g).T)
        w_h_pad = w_h_pad.at[:H, g * Hp:g * Hp + H].set(gate(w_hh, g).T)
        bi = gate(b_ih, g) + (gate(b_hh, g) if g < 2 else 0.0)      # b_hn stays separate
        b_i_pad = b_i_pad.at[0, g * Hp:g * Hp + H].set(bi)
    b_hn_pad = jnp.zeros((1, Hp), jnp.float32).at[0, :H].set(gate(b_hh, 2))
    fc_w_pad = jnp.zeros((Hp, O), jnp.float32).at[:H, :].set(fc_w.T)

    params = {
        "w_i_pad": w_i_pad,                                         # (I, 3Hp) f32
        "b_i_pad": b_i_pad,                                         # (1, 3Hp) f32
        "w_h_pad": w_h_pad.astype(jnp.bfloat16),                    # (Hp, 3Hp) bf16 MXU operand
        "b_hn_pad": b_hn_pad,                                       # (1, Hp) f32
        "fc_w_pad": fc_w_pad,                                       # (Hp, O) f32
        "fc_b_pad": fc_b[None, :],                                  # (1, O) f32
    }
    raw = {"w_ih": w_ih, "w_hh": w_hh, "b_ih": b_ih, "b_hh": b_hh,
           "fc_w": fc_w, "fc_b": fc_b}
    return params, raw


def reference_forward(x, raw, hidden_size=64):
    """Pure-JAX f32 reference of PyTorch MYGRU.forward for verification."""
    H = hidden_size
    B, T, _ = x.shape
    w_ih, w_hh = raw["w_ih"], raw["w_hh"]
    b_ih, b_hh = raw["b_ih"], raw["b_hh"]

    def step(h, x_t):
        gi = x_t @ w_ih.T + b_ih
        gh = h @ w_hh.T + b_hh
        i_r, i_z, i_n = gi[:, :H], gi[:, H:2 * H], gi[:, 2 * H:]
        h_r, h_z, h_n = gh[:, :H], gh[:, H:2 * H], gh[:, 2 * H:]
        r = jax.nn.sigmoid(i_r + h_r)
        z = jax.nn.sigmoid(i_z + h_z)
        n = jnp.tanh(i_n + r * h_n)
        return (1.0 - z) * n + z * h, None

    h0 = jnp.zeros((B, H), jnp.float32)
    h_last, _ = jax.lax.scan(step, h0, jnp.transpose(x, (1, 0, 2)))
    out = h_last @ raw["fc_w"].T + raw["fc_b"]
    return out[:, :, None]


if __name__ == "__main__":
    INPUT, HIDDEN, OUTPUT = 1, 64, 16
    BATCH, WINDOW = 2, 8

    key = jax.random.PRNGKey(0)
    pkey, xkey = jax.random.split(key)
    params, raw = init_params(pkey, INPUT, HIDDEN, OUTPUT)

    x = jax.random.normal(xkey, (BATCH, WINDOW, INPUT), jnp.float32)

    fwd = jax.jit(mygru_forward)
    out = jax.block_until_ready(fwd(x, params))
    assert out.shape == (BATCH, OUTPUT, 1), out.shape

    ref = jax.block_until_ready(reference_forward(x, raw, HIDDEN))
    # bf16 MXU operands in the hidden-gate matmul -> relaxed tolerance vs the
    # f32 reference (per review); gate nonlinearities keep the error contracted.
    if not jnp.allclose(out, ref, atol=2e-2, rtol=2e-2):
        err = float(jnp.max(jnp.abs(out - ref)))
        raise AssertionError(f"Pallas GRU output mismatch vs reference (max abs err {err})")

    print("KERNEL_OK")
</pallas_src>

<mosaic_0001>
module attributes {stable_mosaic.version = 11 : i64} {
  func.func @mygru_kernel(%arg0: i32, %arg1: memref<8x2x1xf32, #tpu.memory_space<vmem>>, %arg2: memref<1x384xf32, #tpu.memory_space<vmem>>, %arg3: memref<1x384xf32, #tpu.memory_space<vmem>>, %arg4: memref<128x384xbf16, #tpu.memory_space<vmem>>, %arg5: memref<1x128xf32, #tpu.memory_space<vmem>>, %arg6: memref<128x16xf32, #tpu.memory_space<vmem>>, %arg7: memref<1x16xf32, #tpu.memory_space<vmem>>, %arg8: memref<2x16xf32, #tpu.memory_space<vmem>>, %arg9: memref<8x2x384xf32, #tpu.memory_space<vmem>>) attributes {dimension_semantics = [#tpu.dimension_semantics<arbitrary>], iteration_bounds = array<i64: 1>, scalar_prefetch = 0 : i64, scratch_operands = 1 : i64, tpu.core_type = #tpu.core_type<tc>, window_params = [{pipeline_mode = #tpu.pipeline_mode<synchronous>, transform_indices = @transform_0, window_bounds = array<i64: 8, 2, 1>}, {pipeline_mode = #tpu.pipeline_mode<synchronous>, transform_indices = @transform_1, window_bounds = array<i64: 1, 384>}, {pipeline_mode = #tpu.pipeline_mode<synchronous>, transform_indices = @transform_2, window_bounds = array<i64: 1, 384>}, {pipeline_mode = #tpu.pipeline_mode<synchronous>, transform_indices = @transform_3, window_bounds = array<i64: 128, 384>}, {pipeline_mode = #tpu.pipeline_mode<synchronous>, transform_indices = @transform_4, window_bounds = array<i64: 1, 128>}, {pipeline_mode = #tpu.pipeline_mode<synchronous>, transform_indices = @transform_5, window_bounds = array<i64: 128, 16>}, {pipeline_mode = #tpu.pipeline_mode<synchronous>, transform_indices = @transform_6, window_bounds = array<i64: 1, 16>}, {pipeline_mode = #tpu.pipeline_mode<synchronous>, transform_indices = @transform_7, window_bounds = array<i64: 2, 16>}]} {
    %c0 = arith.constant 0 : index
    %c0_0 = arith.constant 0 : index
    %0 = vector.load %arg2[%c0, %c0_0] : memref<1x384xf32, #tpu.memory_space<vmem>>, vector<1x384xf32>
    %c0_1 = arith.constant 0 : index
    %c0_2 = arith.constant 0 : index
    %1 = vector.load %arg3[%c0_1, %c0_2] : memref<1x384xf32, #tpu.memory_space<vmem>>, vector<1x384xf32>
    %c0_3 = arith.constant 0 : index
    %c0_4 = arith.constant 0 : index
    %c0_5 = arith.constant 0 : index
    %2 = vector.load %arg1[%c0_3, %c0_4, %c0_5] : memref<8x2x1xf32, #tpu.memory_space<vmem>>, vector<8x2x1xf32>
    %3 = vector.shape_cast %0 : vector<1x384xf32> to vector<1x1x384xf32>
    %4 = vector.broadcast %2 : vector<8x2x1xf32> to vector<8x2x384xf32>
    %5 = vector.broadcast %3 : vector<1x1x384xf32> to vector<8x2x384xf32>
    %6 = arith.mulf %4, %5 : vector<8x2x384xf32>
    %7 = vector.shape_cast %1 : vector<1x384xf32> to vector<1x1x384xf32>
    %8 = vector.broadcast %7 : vector<1x1x384xf32> to vector<8x2x384xf32>
    %9 = arith.addf %6, %8 : vector<8x2x384xf32>
    %c0_6 = arith.constant 0 : index
    %c0_7 = arith.constant 0 : index
    %c0_8 = arith.constant 0 : index
    %10 = vector.load %arg9[%c0_6, %c0_7, %c0_8] : memref<8x2x384xf32, #tpu.memory_space<vmem>>, vector<8x2x384xf32>
    tpu.vector_store %arg9[%c0_6, %c0_7, %c0_8], %9 {strides = array<i32>} : memref<8x2x384xf32, #tpu.memory_space<vmem>>, vector<8x2x384xf32>,
    %c0_9 = arith.constant 0 : index
    %c0_10 = arith.constant 0 : index
    %11 = vector.load %arg4[%c0_9, %c0_10] : memref<128x384xbf16, #tpu.memory_space<vmem>>, vector<128x384xbf16>
    %c0_11 = arith.constant 0 : index
    %c0_12 = arith.constant 0 : index
    %12 = vector.load %arg5[%c0_11, %c0_12] : memref<1x128xf32, #tpu.memory_space<vmem>>, vector<1x128xf32>
    %13 = vector.shape_cast %12 : vector<1x128xf32> to vector<1x128xf32>
    %14 = vector.broadcast %13 : vector<1x128xf32> to vector<2x128xf32>
    %cst = arith.constant 0.000000e+00 : f32
    %15 = vector.broadcast %cst : f32 to vector<2x128xf32>
    %c0_i32 = arith.constant 0 : i32
    %16 = arith.index_cast %c0_i32 : i32 to index
    %c0_13 = arith.constant 0 : index
    %c0_14 = arith.constant 0 : index
    %17 = vector.load %arg9[%16, %c0_13, %c0_14] : memref<8x2x384xf32, #tpu.memory_space<vmem>>, vector<1x2x384xf32>
    %18 = vector.shape_cast %17 : vector<1x2x384xf32> to vector<2x384xf32>
    %19 = arith.truncf %15 : vector<2x128xf32> to vector<2x128xbf16>
    %cst_15 = arith.constant dense<0.000000e+00> : vector<2x384xf32>
    %20 = tpu.matmul %19, %11, %cst_15 {dimension_numbers = #tpu.dot_dimension_numbers<[1], [0], [0], [1], [0, 0, 1, 1], [], []>} : vector<2x128xbf16>, vector<128x384xbf16>, vector<2x384xf32> -> vector<2x384xf32>
    %21 = vector.extract_strided_slice %18 {offsets = [0, 0], sizes = [2, 128], strides = [1, 1]} : vector<2x384xf32> to vector<2x128xf32>
    %22 = vector.extract_strided_slice %20 {offsets = [0, 0], sizes = [2, 128], strides = [1, 1]} : vector<2x384xf32> to vector<2x128xf32>
    %23 = arith.addf %21, %22 : vector<2x128xf32>
    %24 = arith.negf %23 : vector<2x128xf32>
    %25 = math.exp %24 : vector<2x128xf32>
    %cst_16 = arith.constant 1.000000e+00 : f32
    %26 = vector.broadcast %cst_16 : f32 to vector<2x128xf32>
    %27 = arith.addf %26, %25 : vector<2x128xf32>
    %28 = arith.divf %26, %27 : vector<2x128xf32>
    %29 = vector.extract_strided_slice %18 {offsets = [0, 128], sizes = [2, 128], strides = [1, 1]} : vector<2x384xf32> to vector<2x128xf32>
    %30 = vector.extract_strided_slice %20 {offsets = [0, 128], sizes = [2, 128], strides = [1, 1]} : vector<2x384xf32> to vector<2x128xf32>
    %31 = arith.addf %29, %30 : vector<2x128xf32>
    %32 = arith.negf %31 : vector<2x128xf32>
    %33 = math.exp %32 : vector<2x128xf32>
    %cst_17 = arith.constant 1.000000e+00 : f32
    %34 = vector.broadcast %cst_17 : f32 to vector<2x128xf32>
    %35 = arith.addf %34, %33 : vector<2x128xf32>
    %36 = arith.divf %34, %35 : vector<2x128xf32>
    %37 = vector.extract_strided_slice %18 {offsets = [0, 256], sizes = [2, 128], strides = [1, 1]} : vector<2x384xf32> to vector<2x128xf32>
    %38 = vector.extract_strided_slice %20 {offsets = [0, 256], sizes = [2, 128], strides = [1, 1]} : vector<2x384xf32> to vector<2x128xf32>
    %39 = arith.addf %38, %14 : vector<2x128xf32>
    %40 = arith.mulf %28, %39 : vector<2x128xf32>
    %41 = arith.addf %37, %40 : vector<2x128xf32>
    %42 = math.tanh %41 : vector<2x128xf32>
    %cst_18 = arith.constant 1.000000e+00 : f32
    %43 = vector.broadcast %cst_18 : f32 to vector<2x128xf32>
    %44 = arith.subf %43, %36 : vector<2x128xf32>
    %45 = arith.mulf %44, %42 : vector<2x128xf32>
    %46 = arith.mulf %36, %15 : vector<2x128xf32>
    %47 = arith.addf %45, %46 : vector<2x128xf32>
    %c1_i32 = arith.constant 1 : i32
    %48 = arith.index_cast %c1_i32 : i32 to index
    %c0_19 = arith.constant 0 : index
    %c0_20 = arith.constant 0 : index
    %49 = vector.load %arg9[%48, %c0_19, %c0_20] : memref<8x2x384xf32, #tpu.memory_space<vmem>>, vector<1x2x384xf32>
    %50 = vector.shape_cast %49 : vector<1x2x384xf32> to vector<2x384xf32>
    %51 = arith.truncf %47 : vector<2x128xf32> to vector<2x128xbf16>
    %cst_21 = arith.constant dense<0.000000e+00> : vector<2x384xf32>
    %52 = tpu.matmul %51, %11, %cst_21 {dimension_numbers = #tpu.dot_dimension_numbers<[1], [0], [0], [1], [0, 0, 1, 1], [], []>} : vector<2x128xbf16>, vector<128x384xbf16>, vector<2x384xf32> -> vector<2x384xf32>
    %53 = vector.extract_strided_slice %50 {offsets = [0, 0], sizes = [2, 128], strides = [1, 1]} : vector<2x384xf32> to vector<2x128xf32>
    %54 = vector.extract_strided_slice %52 {offsets = [0, 0], sizes = [2, 128], strides = [1, 1]} : vector<2x384xf32> to vector<2x128xf32>
    %55 = arith.addf %53, %54 : vector<2x128xf32>
    %56 = arith.negf %55 : vector<2x128xf32>
    %57 = math.exp %56 : vector<2x128xf32>
    %cst_22 = arith.constant 1.000000e+00 : f32
    %58 = vector.broadcast %cst_22 : f32 to vector<2x128xf32>
    %59 = arith.addf %58, %57 : vector<2x128xf32>
    %60 = arith.divf %58, %59 : vector<2x128xf32>
    %61 = vector.extract_strided_slice %50 {offsets = [0, 128], sizes = [2, 128], strides = [1, 1]} : vector<2x384xf32> to vector<2x128xf32>
    %62 = vector.extract_strided_slice %52 {offsets = [0, 128], sizes = [2, 128], strides = [1, 1]} : vector<2x384xf32> to vector<2x128xf32>
    %63 = arith.addf %61, %62 : vector<2x128xf32>
    %64 = arith.negf %63 : vector<2x128xf32>
    %65 = math.exp %64 : vector<2x128xf32>
    %cst_23 = arith.constant 1.000000e+00 : f32
    %66 = vector.broadcast %cst_23 : f32 to vector<2x128xf32>
    %67 = arith.addf %66, %65 : vector<2x128xf32>
    %68 = arith.divf %66, %67 : vector<2x128xf32>
    %69 = vector.extract_strided_slice %50 {offsets = [0, 256], sizes = [2, 128], strides = [1, 1]} : vector<2x384xf32> to vector<2x128xf32>
    %70 = vector.extract_strided_slice %52 {offsets = [0, 256], sizes = [2, 128], strides = [1, 1]} : vector<2x384xf32> to vector<2x128xf32>
    %71 = arith.addf %70, %14 : vector<2x128xf32>
    %72 = arith.mulf %60, %71 : vector<2x128xf32>
    %73 = arith.addf %69, %72 : vector<2x128xf32>
    %74 = math.tanh %73 : vector<2x128xf32>
    %cst_24 = arith.constant 1.000000e+00 : f32
    %75 = vector.broadcast %cst_24 : f32 to vector<2x128xf32>
    %76 = arith.subf %75, %68 : vector<2x128xf32>
    %77 = arith.mulf %76, %74 : vector<2x128xf32>
    %78 = arith.mulf %68, %47 : vector<2x128xf32>
    %79 = arith.addf %77, %78 : vector<2x128xf32>
    %c2_i32 = arith.constant 2 : i32
    %80 = arith.index_cast %c2_i32 : i32 to index
    %c0_25 = arith.constant 0 : index
    %c0_26 = arith.constant 0 : index
    %81 = vector.load %arg9[%80, %c0_25, %c0_26] : memref<8x2x384xf32, #tpu.memory_space<vmem>>, vector<1x2x384xf32>
    %82 = vector.shape_cast %81 : vector<1x2x384xf32> to vector<2x384xf32>
    %83 = arith.truncf %79 : vector<2x128xf32> to vector<2x128xbf16>
    %cst_27 = arith.constant dense<0.000000e+00> : vector<2x384xf32>
    %84 = tpu.matmul %83, %11, %cst_27 {dimension_numbers = #tpu.dot_dimension_numbers<[1], [0], [0], [1], [0, 0, 1, 1], [], []>} : vector<2x128xbf16>, vector<128x384xbf16>, vector<2x384xf32> -> vector<2x384xf32>
    %85 = vector.extract_strided_slice %82 {offsets = [0, 0], sizes = [2, 128], strides = [1, 1]} : vector<2x384xf32> to vector<2x128xf32>
    %86 = vector.extract_strided_slice %84 {offsets = [0, 0], sizes = [2, 128], strides = [1, 1]} : vector<2x384xf32> to vector<2x128xf32>
    %87 = arith.addf %85, %86 : vector<2x128xf32>
    %88 = arith.negf %87 : vector<2x128xf32>
    %89 = math.exp %88 : vector<2x128xf32>
    %cst_28 = arith.constant 1.000000e+00 : f32
    %90 = vector.broadcast %cst_28 : f32 to vector<2x128xf32>
    %91 = arith.addf %90, %89 : vector<2x128xf32>
    %92 = arith.divf %90, %91 : vector<2x128xf32>
    %93 = vector.extract_strided_slice %82 {offsets = [0, 128], sizes = [2, 128], strides = [1, 1]} : vector<2x384xf32> to vector<2x128xf32>
    %94 = vector.extract_strided_slice %84 {offsets = [0, 128], sizes = [2, 128], strides = [1, 1]} : vector<2x384xf32> to vector<2x128xf32>
    %95 = arith.addf %93, %94 : vector<2x128xf32>
    %96 = arith.negf %95 : vector<2x128xf32>
    %97 = math.exp %96 : vector<2x128xf32>
    %cst_29 = arith.constant 1.000000e+00 : f32
    %98 = vector.broadcast %cst_29 : f32 to vector<2x128xf32>
    %99 = arith.addf %98, %97 : vector<2x128xf32>
    %100 = arith.divf %98, %99 : vector<2x128xf32>
    %101 = vector.extract_strided_slice %82 {offsets = [0, 256], sizes = [2, 128], strides = [1, 1]} : vector<2x384xf32> to vector<2x128xf32>
    %102 = vector.extract_strided_slice %84 {offsets = [0, 256], sizes = [2, 128], strides = [1, 1]} : vector<2x384xf32> to vector<2x128xf32>
    %103 = arith.addf %102, %14 : vector<2x128xf32>
    %104 = arith.mulf %92, %103 : vector<2x128xf32>
    %105 = arith.addf %101, %104 : vector<2x128xf32>
    %106 = math.tanh %105 : vector<2x128xf32>
    %cst_30 = arith.constant 1.000000e+00 : f32
    %107 = vector.broadcast %cst_30 : f32 to vector<2x128xf32>
    %108 = arith.subf %107, %100 : vector<2x128xf32>
    %109 = arith.mulf %108, %106 : vector<2x128xf32>
    %110 = arith.mulf %100, %79 : vector<2x128xf32>
    %111 = arith.addf %109, %110 : vector<2x128xf32>
    %c3_i32 = arith.constant 3 : i32
    %112 = arith.index_cast %c3_i32 : i32 to index
    %c0_31 = arith.constant 0 : index
    %c0_32 = arith.constant 0 : index
    %113 = vector.load %arg9[%112, %c0_31, %c0_32] : memref<8x2x384xf32, #tpu.memory_space<vmem>>, vector<1x2x384xf32>
    %114 = vector.shape_cast %113 : vector<1x2x384xf32> to vector<2x384xf32>
    %115 = arith.truncf %111 : vector<2x128xf32> to vector<2x128xbf16>
    %cst_33 = arith.constant dense<0.000000e+00> : vector<2x384xf32>
    %116 = tpu.matmul %115, %11, %cst_33 {dimension_numbers = #tpu.dot_dimension_numbers<[1], [0], [0], [1], [0, 0, 1, 1], [], []>} : vector<2x128xbf16>, vector<128x384xbf16>, vector<2x384xf32> -> vector<2x384xf32>
    %117 = vector.extract_strided_slice %114 {offsets = [0, 0], sizes = [2, 128], strides = [1, 1]} : vector<2x384xf32> to vector<2x128xf32>
    %118 = vector.extract_strided_slice %116 {offsets = [0, 0], sizes = [2, 128], strides = [1, 1]} : vector<2x384xf32> to vector<2x128xf32>
    %119 = arith.addf %117, %118 : vector<2x128xf32>
    %120 = arith.negf %119 : vector<2x128xf32>
    %121 = math.exp %120 : vector<2x128xf32>
    %cst_34 = arith.constant 1.000000e+00 : f32
    %122 = vector.broadcast %cst_34 : f32 to vector<2x128xf32>
    %123 = arith.addf %122, %121 : vector<2x128xf32>
    %124 = arith.divf %122, %123 : vector<2x128xf32>
    %125 = vector.extract_strided_slice %114 {offsets = [0, 128], sizes = [2, 128], strides = [1, 1]} : vector<2x384xf32> to vector<2x128xf32>
    %126 = vector.extract_strided_slice %116 {offsets = [0, 128], sizes = [2, 128], strides = [1, 1]} : vector<2x384xf32> to vector<2x128xf32>
    %127 = arith.addf %125, %126 : vector<2x128xf32>
    %128 = arith.negf %127 : vector<2x128xf32>
    %129 = math.exp %128 : vector<2x128xf32>
    %cst_35 = arith.constant 1.000000e+00 : f32
    %130 = vector.broadcast %cst_35 : f32 to vector<2x128xf32>
    %131 = arith.addf %130, %129 : vector<2x128xf32>
    %132 = arith.divf %130, %131 : vector<2x128xf32>
    %133 = vector.extract_strided_slice %114 {offsets = [0, 256], sizes = [2, 128], strides = [1, 1]} : vector<2x384xf32> to vector<2x128xf32>
    %134 = vector.extract_strided_slice %116 {offsets = [0, 256], sizes = [2, 128], strides = [1, 1]} : vector<2x384xf32> to vector<2x128xf32>
    %135 = arith.addf %134, %14 : vector<2x128xf32>
    %136 = arith.mulf %124, %135 : vector<2x128xf32>
    %137 = arith.addf %133, %136 : vector<2x128xf32>
    %138 = math.tanh %137 : vector<2x128xf32>
    %cst_36 = arith.constant 1.000000e+00 : f32
    %139 = vector.broadcast %cst_36 : f32 to vector<2x128xf32>
    %140 = arith.subf %139, %132 : vector<2x128xf32>
    %141 = arith.mulf %140, %138 : vector<2x128xf32>
    %142 = arith.mulf %132, %111 : vector<2x128xf32>
    %143 = arith.addf %141, %142 : vector<2x128xf32>
    %c4_i32 = arith.constant 4 : i32
    %144 = arith.index_cast %c4_i32 : i32 to index
    %c0_37 = arith.constant 0 : index
    %c0_38 = arith.constant 0 : index
    %145 = vector.load %arg9[%144, %c0_37, %c0_38] : memref<8x2x384xf32, #tpu.memory_space<vmem>>, vector<1x2x384xf32>
    %146 = vector.shape_cast %145 : vector<1x2x384xf32> to vector<2x384xf32>
    %147 = arith.truncf %143 : vector<2x128xf32> to vector<2x128xbf16>
    %cst_39 = arith.constant dense<0.000000e+00> : vector<2x384xf32>
    %148 = tpu.matmul %147, %11, %cst_39 {dimension_numbers = #tpu.dot_dimension_numbers<[1], [0], [0], [1], [0, 0, 1, 1], [], []>} : vector<2x128xbf16>, vector<128x384xbf16>, vector<2x384xf32> -> vector<2x384xf32>
    %149 = vector.extract_strided_slice %146 {offsets = [0, 0], sizes = [2, 128], strides = [1, 1]} : vector<2x384xf32> to vector<2x128xf32>
    %150 = vector.extract_strided_slice %148 {offsets = [0, 0], sizes = [2, 128], strides = [1, 1]} : vector<2x384xf32> to vector<2x128xf32>
    %151 = arith.addf %149, %150 : vector<2x128xf32>
    %152 = arith.negf %151 : vector<2x128xf32>
    %153 = math.exp %152 : vector<2x128xf32>
    %cst_40 = arith.constant 1.000000e+00 : f32
    %154 = vector.broadcast %cst_40 : f32 to vector<2x128xf32>
    %155 = arith.addf %154, %153 : vector<2x128xf32>
    %156 = arith.divf %154, %155 : vector<2x128xf32>
    %157 = vector.extract_strided_slice %146 {offsets = [0, 128], sizes = [2, 128], strides = [1, 1]} : vector<2x384xf32> to vector<2x128xf32>
    %158 = vector.extract_strided_slice %148 {offsets = [0, 128], sizes = [2, 128], strides = [1, 1]} : vector<2x384xf32> to vector<2x128xf32>
    %159 = arith.addf %157, %158 : vector<2x128xf32>
    %160 = arith.negf %159 : vector<2x128xf32>
    %161 = math.exp %160 : vector<2x128xf32>
    %cst_41 = arith.constant 1.000000e+00 : f32
    %162 = vector.broadcast %cst_41 : f32 to vector<2x128xf32>
    %163 = arith.addf %162, %161 : vector<2x128xf32>
    %164 = arith.divf %162, %163 : vector<2x128xf32>
    %165 = vector.extract_strided_slice %146 {offsets = [0, 256], sizes = [2, 128], strides = [1, 1]} : vector<2x384xf32> to vector<2x128xf32>
    %166 = vector.extract_strided_slice %148 {offsets = [0, 256], sizes = [2, 128], strides = [1, 1]} : vector<2x384xf32> to vector<2x128xf32>
    %167 = arith.addf %166, %14 : vector<2x128xf32>
    %168 = arith.mulf %156, %167 : vector<2x128xf32>
    %169 = arith.addf %165, %168 : vector<2x128xf32>
    %170 = math.tanh %169 : vector<2x128xf32>
    %cst_42 = arith.constant 1.000000e+00 : f32
    %171 = vector.broadcast %cst_42 : f32 to vector<2x128xf32>
    %172 = arith.subf %171, %164 : vector<2x128xf32>
    %173 = arith.mulf %172, %170 : vector<2x128xf32>
    %174 = arith.mulf %164, %143 : vector<2x128xf32>
    %175 = arith.addf %173, %174 : vector<2x128xf32>
    %c5_i32 = arith.constant 5 : i32
    %176 = arith.index_cast %c5_i32 : i32 to index
    %c0_43 = arith.constant 0 : index
    %c0_44 = arith.constant 0 : index
    %177 = vector.load %arg9[%176, %c0_43, %c0_44] : memref<8x2x384xf32, #tpu.memory_space<vmem>>, vector<1x2x384xf32>
    %178 = vector.shape_cast %177 : vector<1x2x384xf32> to vector<2x384xf32>
    %179 = arith.truncf %175 : vector<2x128xf32> to vector<2x128xbf16>
    %cst_45 = arith.constant dense<0.000000e+00> : vector<2x384xf32>
    %180 = tpu.matmul %179, %11, %cst_45 {dimension_numbers = #tpu.dot_dimension_numbers<[1], [0], [0], [1], [0, 0, 1, 1], [], []>} : vector<2x128xbf16>, vector<128x384xbf16>, vector<2x384xf32> -> vector<2x384xf32>
    %181 = vector.extract_strided_slice %178 {offsets = [0, 0], sizes = [2, 128], strides = [1, 1]} : vector<2x384xf32> to vector<2x128xf32>
    %182 = vector.extract_strided_slice %180 {offsets = [0, 0], sizes = [2, 128], strides = [1, 1]} : vector<2x384xf32> to vector<2x128xf32>
    %183 = arith.addf %181, %182 : vector<2x128xf32>
    %184 = arith.negf %183 : vector<2x128xf32>
    %185 = math.exp %184 : vector<2x128xf32>
    %cst_46 = arith.constant 1.000000e+00 : f32
    %186 = vector.broadcast %cst_46 : f32 to vector<2x128xf32>
    %187 = arith.addf %186, %185 : vector<2x128xf32>
    %188 = arith.divf %186, %187 : vector<2x128xf32>
    %189 = vector.extract_strided_slice %178 {offsets = [0, 128], sizes = [2, 128], strides = [1, 1]} : vector<2x384xf32> to vector<2x128xf32>
    %190 = vector.extract_strided_slice %180 {offsets = [0, 128], sizes = [2, 128], strides = [1, 1]} : vector<2x384xf32> to vector<2x128xf32>
    %191 = arith.addf %189, %190 : vector<2x128xf32>
    %192 = arith.negf %191 : vector<2x128xf32>
    %193 = math.exp %192 : vector<2x128xf32>
    %cst_47 = arith.constant 1.000000e+00 : f32
    %194 = vector.broadcast %cst_47 : f32 to vector<2x128xf32>
    %195 = arith.addf %194, %193 : vector<2x128xf32>
    %196 = arith.divf %194, %195 : vector<2x128xf32>
    %197 = vector.extract_strided_slice %178 {offsets = [0, 256], sizes = [2, 128], strides = [1, 1]} : vector<2x384xf32> to vector<2x128xf32>
    %198 = vector.extract_strided_slice %180 {offsets = [0, 256], sizes = [2, 128], strides = [1, 1]} : vector<2x384xf32> to vector<2x128xf32>
    %199 = arith.addf %198, %14 : vector<2x128xf32>
    %200 = arith.mulf %188, %199 : vector<2x128xf32>
    %201 = arith.addf %197, %200 : vector<2x128xf32>
    %202 = math.tanh %201 : vector<2x128xf32>
    %cst_48 = arith.constant 1.000000e+00 : f32
    %203 = vector.broadcast %cst_48 : f32 to vector<2x128xf32>
    %204 = arith.subf %203, %196 : vector<2x128xf32>
    %205 = arith.mulf %204, %202 : vector<2x128xf32>
    %206 = arith.mulf %196, %175 : vector<2x128xf32>
    %207 = arith.addf %205, %206 : vector<2x128xf32>
    %c6_i32 = arith.constant 6 : i32
    %208 = arith.index_cast %c6_i32 : i32 to index
    %c0_49 = arith.constant 0 : index
    %c0_50 = arith.constant 0 : index
    %209 = vector.load %arg9[%208, %c0_49, %c0_50] : memref<8x2x384xf32, #tpu.memory_space<vmem>>, vector<1x2x384xf32>
    %210 = vector.shape_cast %209 : vector<1x2x384xf32> to vector<2x384xf32>
    %211 = arith.truncf %207 : vector<2x128xf32> to vector<2x128xbf16>
    %cst_51 = arith.constant dense<0.000000e+00> : vector<2x384xf32>
    %212 = tpu.matmul %211, %11, %cst_51 {dimension_numbers = #tpu.dot_dimension_numbers<[1], [0], [0], [1], [0, 0, 1, 1], [], []>} : vector<2x128xbf16>, vector<128x384xbf16>, vector<2x384xf32> -> vector<2x384xf32>
    %213 = vector.extract_strided_slice %210 {offsets = [0, 0], sizes = [2, 128], strides = [1, 1]} : vector<2x384xf32> to vector<2x128xf32>
    %214 = vector.extract_strided_slice %212 {offsets = [0, 0], sizes = [2, 128], strides = [1, 1]} : vector<2x384xf32> to vector<2x128xf32>
    %215 = arith.addf %213, %214 : vector<2x128xf32>
    %216 = arith.negf %215 : vector<2x128xf32>
    %217 = math.exp %216 : vector<2x128xf32>
    %cst_52 = arith.constant 1.000000e+00 : f32
    %218 = vector.broadcast %cst_52 : f32 to vector<2x128xf32>
    %219 = arith.addf %218, %217 : vector<2x128xf32>
    %220 = arith.divf %218, %219 : vector<2x128xf32>
    %221 = vector.extract_strided_slice %210 {offsets = [0, 128], sizes = [2, 128], strides = [1, 1]} : vector<2x384xf32> to vector<2x128xf32>
    %222 = vector.extract_strided_slice %212 {offsets = [0, 128], sizes = [2, 128], strides = [1, 1]} : vector<2x384xf32> to vector<2x128xf32>
    %223 = arith.addf %221, %222 : vector<2x128xf32>
    %224 = arith.negf %223 : vector<2x128xf32>
    %225 = math.exp %224 : vector<2x128xf32>
    %cst_53 = arith.constant 1.000000e+00 : f32
    %226 = vector.broadcast %cst_53 : f32 to vector<2x128xf32>
    %227 = arith.addf %226, %225 : vector<2x128xf32>
    %228 = arith.divf %226, %227 : vector<2x128xf32>
    %229 = vector.extract_strided_slice %210 {offsets = [0, 256], sizes = [2, 128], strides = [1, 1]} : vector<2x384xf32> to vector<2x128xf32>
    %230 = vector.extract_strided_slice %212 {offsets = [0, 256], sizes = [2, 128], strides = [1, 1]} : vector<2x384xf32> to vector<2x128xf32>
    %231 = arith.addf %230, %14 : vector<2x128xf32>
    %232 = arith.mulf %220, %231 : vector<2x128xf32>
    %233 = arith.addf %229, %232 : vector<2x128xf32>
    %234 = math.tanh %233 : vector<2x128xf32>
    %cst_54 = arith.constant 1.000000e+00 : f32
    %235 = vector.broadcast %cst_54 : f32 to vector<2x128xf32>
    %236 = arith.subf %235, %228 : vector<2x128xf32>
    %237 = arith.mulf %236, %234 : vector<2x128xf32>
    %238 = arith.mulf %228, %207 : vector<2x128xf32>
    %239 = arith.addf %237, %238 : vector<2x128xf32>
    %c7_i32 = arith.constant 7 : i32
    %240 = arith.index_cast %c7_i32 : i32 to index
    %c0_55 = arith.constant 0 : index
    %c0_56 = arith.constant 0 : index
    %241 = vector.load %arg9[%240, %c0_55, %c0_56] : memref<8x2x384xf32, #tpu.memory_space<vmem>>, vector<1x2x384xf32>
    %242 = vector.shape_cast %241 : vector<1x2x384xf32> to vector<2x384xf32>
    %243 = arith.truncf %239 : vector<2x128xf32> to vector<2x128xbf16>
    %cst_57 = arith.constant dense<0.000000e+00> : vector<2x384xf32>
    %244 = tpu.matmul %243, %11, %cst_57 {dimension_numbers = #tpu.dot_dimension_numbers<[1], [0], [0], [1], [0, 0, 1, 1], [], []>} : vector<2x128xbf16>, vector<128x384xbf16>, vector<2x384xf32> -> vector<2x384xf32>
    %245 = vector.extract_strided_slice %242 {offsets = [0, 0], sizes = [2, 128], strides = [1, 1]} : vector<2x384xf32> to vector<2x128xf32>
    %246 = vector.extract_strided_slice %244 {offsets = [0, 0], sizes = [2, 128], strides = [1, 1]} : vector<2x384xf32> to vector<2x128xf32>
    %247 = arith.addf %245, %246 : vector<2x128xf32>
    %248 = arith.negf %247 : vector<2x128xf32>
    %249 = math.exp %248 : vector<2x128xf32>
    %cst_58 = arith.constant 1.000000e+00 : f32
    %250 = vector.broadcast %cst_58 : f32 to vector<2x128xf32>
    %251 = arith.addf %250, %249 : vector<2x128xf32>
    %252 = arith.divf %250, %251 : vector<2x128xf32>
    %253 = vector.extract_strided_slice %242 {offsets = [0, 128], sizes = [2, 128], strides = [1, 1]} : vector<2x384xf32> to vector<2x128xf32>
    %254 = vector.extract_strided_slice %244 {offsets = [0, 128], sizes = [2, 128], strides = [1, 1]} : vector<2x384xf32> to vector<2x128xf32>
    %255 = arith.addf %253, %254 : vector<2x128xf32>
    %256 = arith.negf %255 : vector<2x128xf32>
    %257 = math.exp %256 : vector<2x128xf32>
    %cst_59 = arith.constant 1.000000e+00 : f32
    %258 = vector.broadcast %cst_59 : f32 to vector<2x128xf32>
    %259 = arith.addf %258, %257 : vector<2x128xf32>
    %260 = arith.divf %258, %259 : vector<2x128xf32>
    %261 = vector.extract_strided_slice %242 {offsets = [0, 256], sizes = [2, 128], strides = [1, 1]} : vector<2x384xf32> to vector<2x128xf32>
    %262 = vector.extract_strided_slice %244 {offsets = [0, 256], sizes = [2, 128], strides = [1, 1]} : vector<2x384xf32> to vector<2x128xf32>
    %263 = arith.addf %262, %14 : vector<2x128xf32>
    %264 = arith.mulf %252, %263 : vector<2x128xf32>
    %265 = arith.addf %261, %264 : vector<2x128xf32>
    %266 = math.tanh %265 : vector<2x128xf32>
    %cst_60 = arith.constant 1.000000e+00 : f32
    %267 = vector.broadcast %cst_60 : f32 to vector<2x128xf32>
    %268 = arith.subf %267, %260 : vector<2x128xf32>
    %269 = arith.mulf %268, %266 : vector<2x128xf32>
    %270 = arith.mulf %260, %239 : vector<2x128xf32>
    %271 = arith.addf %269, %270 : vector<2x128xf32>
    %c8_i32 = arith.constant 8 : i32
    %c0_61 = arith.constant 0 : index
    %c0_62 = arith.constant 0 : index
    %272 = vector.load %arg6[%c0_61, %c0_62] : memref<128x16xf32, #tpu.memory_space<vmem>>, vector<128x16xf32>
    %cst_63 = arith.constant dense<0.000000e+00> : vector<2x16xf32>
    %273 = tpu.matmul %271, %272, %cst_63 {dimension_numbers = #tpu.dot_dimension_numbers<[1], [0], [0], [1], [0, 0, 1, 1], [], []>} : vector<2x128xf32>, vector<128x16xf32>, vector<2x16xf32> -> vector<2x16xf32>
    %c0_64 = arith.constant 0 : index
    %c0_65 = arith.constant 0 : index
    %274 = vector.load %arg7[%c0_64, %c0_65] : memref<1x16xf32, #tpu.memory_space<vmem>>, vector<1x16xf32>
    %275 = vector.broadcast %274 : vector<1x16xf32> to vector<2x16xf32>
    %276 = arith.addf %273, %275 : vector<2x16xf32>
    %c0_66 = arith.constant 0 : index
    %c0_67 = arith.constant 0 : index
    %277 = vector.load %arg8[%c0_66, %c0_67] : memref<2x16xf32, #tpu.memory_space<vmem>>, vector<2x16xf32>
    tpu.vector_store %arg8[%c0_66, %c0_67], %276 {strides = array<i32>} : memref<2x16xf32, #tpu.memory_space<vmem>>, vector<2x16xf32>,
    return
  }
  func.func @transform_0(%arg0: i32) -> (i32, i32, i32) {
    %c0_i32 = arith.constant 0 : i32
    %c0_i32_0 = arith.constant 0 : i32
    %c0_i32_1 = arith.constant 0 : i32
    %c0_i32_2 = arith.constant 0 : i32
    return %c0_i32, %c0_i32_0, %c0_i32_1 : i32, i32, i32
  }
  func.func @transform_1(%arg0: i32) -> (i32, i32) {
    %c0_i32 = arith.constant 0 : i32
    %c0_i32_0 = arith.constant 0 : i32
    %c0_i32_1 = arith.constant 0 : i32
    return %c0_i32, %c0_i32_0 : i32, i32
  }
  func.func @transform_2(%arg0: i32) -> (i32, i32) {
    %c0_i32 = arith.constant 0 : i32
    %c0_i32_0 = arith.constant 0 : i32
    %c0_i32_1 = arith.constant 0 : i32
    return %c0_i32, %c0_i32_0 : i32, i32
  }
  func.func @transform_3(%arg0: i32) -> (i32, i32) {
    %c0_i32 = arith.constant 0 : i32
    %c0_i32_0 = arith.constant 0 : i32
    %c0_i32_1 = arith.constant 0 : i32
    return %c0_i32, %c0_i32_0 : i32, i32
  }
  func.func @transform_4(%arg0: i32) -> (i32, i32) {
    %c0_i32 = arith.constant 0 : i32
    %c0_i32_0 = arith.constant 0 : i32
    %c0_i32_1 = arith.constant 0 : i32
    return %c0_i32, %c0_i32_0 : i32, i32
  }
  func.func @transform_5(%arg0: i32) -> (i32, i32) {
    %c0_i32 = arith.constant 0 : i32
    %c0_i32_0 = arith.constant 0 : i32
    %c0_i32_1 = arith.constant 0 : i32
    return %c0_i32, %c0_i32_0 : i32, i32
  }
  func.func @transform_6(%arg0: i32) -> (i32, i32) {
    %c0_i32 = arith.constant 0 : i32
    %c0_i32_0 = arith.constant 0 : i32
    %c0_i32_1 = arith.constant 0 : i32
    return %c0_i32, %c0_i32_0 : i32, i32
  }
  func.func @transform_7(%arg0: i32) -> (i32, i32) {
    %c0_i32 = arith.constant 0 : i32
    %c0_i32_0 = arith.constant 0 : i32
    %c0_i32_1 = arith.constant 0 : i32
    return %c0_i32, %c0_i32_0 : i32, i32
  }
}

</mosaic_0001>

<bundles_post_ra>
// kernel: mygru_forward.1
= control target key start
LH: loop header
LB: loop body
LE: loop exit
PB: predicated region body
PF: predicated region fallthrough
CT: control target
= control target key end

     0   :  { %12 = vsyncpa [#allocation4], 0  ;;  %s1992_s0 = inlined_call_operand.vmem [shape: f32[8,2,1], index: 0, kind: input, shape index: {}]   ;;  %s1993_s1 = inlined_call_operand.vmem [shape: f32[1,384], index: 1, kind: input, shape index: {}]   ;;  %s1994_s2 = inlined_call_operand.vmem [shape: f32[1,384], index: 2, kind: input, shape index: {}]   ;;  %s1995_s3 = inlined_call_operand.hbm [shape: bf16[128,384], index: 3, kind: input, shape index: {}]   ;;  %s1996_s4 = inlined_call_operand.vmem [shape: f32[1,128], index: 4, kind: input, shape index: {}]   ;;  %s1997_s5 = inlined_call_operand.vmem [shape: f32[128,16], index: 5, kind: input, shape index: {}]   ;;  %s1998_s6 = inlined_call_operand.vmem [shape: f32[1,16], index: 6, kind: input, shape index: {}]   ;;  %s1999_s7 = inlined_call_operand.hbm [shape: f32[2,16], index: 7, kind: output, shape index: {}]  }
   0x1   :  { %13 = vsyncpa [#allocation5], 0  ;;  %s24_s26 = sshll.u32 %s1995_s3, 4  ;;  %s1490_s27 = smov [#allocation3]   ;;  %s25_s26 = int_to_ptr.hbm [resolvable:$true] %s24_s26 }
   0x2   :  { %s26_s28 = sshll.u32 %s1490_s27, 4  ;;  %s1491_s29 = smov 192   ;;  %s27_s28 = int_to_ptr.vmem [resolvable:$true] %s26_s28 }
   0x3   :  { %s1492_s30 = smov 12  }
   0x4   :  { %32 = dma.hbm_to_vmem [thread:$0]  %s25_s26, 3072, %s27_s28, [#allocation4], %s1491_s29, %s1491_s29, %s1492_s30  }
   0x5   :  { %1486 = dma.done.wait [#allocation4], 3072  }
   0x6   :  { %1487 = vsyncadd [#allocation4], 4294964224  ;;  %v1493_v0 = vmov 0   ;;  %v1297_v1 = vld [vmem:[#allocation3 + $0xa8] sm:$0xf]  ;;  %vm196_vm0 = vcmask 1041408  }
   0x7   :  { %1352 = vset.pattern.permute.xlu0 %v1493_v0  ;;  %1353 = vset.pattern.permute.xlu1 %v1493_v0  ;;  %v1345_v2 = vld [vmem:[#allocation3 + $0xb0] sm:$0xf0]  ;;  %v1344_v3 = vld [vmem:[#allocation3 + $0xac] sm:$0xf]  ;;  %v1299_v5 = vld [vmem:[#allocation3 + $0xb4] sm:$0xf0] }
   0x8   :  { %1354 = vset.pattern.permute.xlu2 %v1493_v0  ;;  %v1541_v4 = vor.u32 %v1345_v2, %v1297_v1  ;;  %v1285_v6 = vld [vmem:[#allocation3 + $0x90] sm:$0xf]  ;;  %v1342_v7 = vld [vmem:[#allocation3 + $0x98] sm:$0xf0]  ;;  %v1543_v8 = vor.u32 %v1344_v3, %v1299_v5  ;;  %v1341_v9 = vld [vmem:[#allocation3 + $0x94] sm:$0xf] }
   0x9   :  { %v1287_v10 = vld [vmem:[#allocation3 + $0x9c] sm:$0xf0]  ;;  %v1546_v11 = vor.u32 %v1342_v7, %v1285_v6  ;;  %v1273_v13 = vld [vmem:[#allocation3 + $0x78] sm:$0xf]  ;;  %v1339_v14 = vld [vmem:[#allocation3 + $0x80] sm:$0xf0] }
   0xa   :  { %395 = vmatpush.bf16.msra.mxu0 %v1541_v4  ;;  %490 = vmatpush.bf16.msra.mxu3 %v1541_v4  ;;  %v1550_v12 = vor.u32 %v1341_v9, %v1287_v10  ;;  %v46_v15 = vld [vmem:[%s1992_s0] sm:$0x3]  ;;  %v1338_v16 = vld [vmem:[#allocation3 + $0x7c] sm:$0xf]  ;;  %v1275_v17 = vld [vmem:[#allocation3 + $0x84] sm:$0xf0]  ;;  %v1556_v20 = vor.u32 %v1339_v14, %v1273_v13 }
   0xb   :  { %408 = vmatpush.bf16.msra.mxu1 %v1543_v8  ;;  %56 = vperm.xlu0 %1352, %v46_v15   ;;  %v1305_v18 = vld [vmem:[#allocation3 + $0xb0] sm:$0xf]  ;;  %v1346_v19 = vld [vmem:[#allocation3 + $0xb8] sm:$0xf0]  ;;  %v1261_v21 = vld [vmem:[#allocation3 + $0x60] sm:$0xf]  ;;  %v1562_v23 = vor.u32 %v1338_v16, %v1275_v17 }
   0xc   :  { %v1558_v22 = vor.u32 %v1346_v19, %v1305_v18  ;;  %v1336_v24 = vld [vmem:[#allocation3 + $0x68] sm:$0xf0]  ;;  %v1293_v25 = vld [vmem:[#allocation3 + $0x98] sm:$0xf]  ;;  %v1343_v26 = vld [vmem:[#allocation3 + $0xa0] sm:$0xf0] }
   0xd   :  { %v1335_v27 = vld [vmem:[#allocation3 + $0x64] sm:$0xf]  ;;  %v1263_v28 = vld [vmem:[#allocation3 + $0x6c] sm:$0xf0]  ;;  %v1565_v29 = vor.u32 %v1343_v26, %v1293_v25  ;;  %v1281_v31 = vld [vmem:[#allocation3 + $0x80] sm:$0xf]  ;;  %v1571_v33 = vor.u32 %v1336_v24, %v1261_v21 }
   0xe   :  { %396 = vmatpush.bf16.msra.mxu0 %v1546_v11  ;;  %491 = vmatpush.bf16.msra.mxu3 %v1546_v11  ;;  %v47_v30 = vld [vmem:[%s1992_s0 + $0x2] sm:$0x3]  ;;  %v1340_v32 = vld [vmem:[#allocation3 + $0x88] sm:$0xf0]  ;;  %v1575_v34 = vor.u32 %v1335_v27, %v1263_v28  ;;  %v1249_v35 = vld [vmem:[#allocation3 + $0x48] sm:$0xf] }
   0xf   :  { %409 = vmatpush.bf16.msra.mxu1 %v1550_v12  ;;  %421 = vmatpush.bf16.msra.mxu2 %v1558_v22  ;;  %v1333_v36 = vld [vmem:[#allocation3 + $0x50] sm:$0xf0]  ;;  %v1332_v37 = vld [vmem:[#allocation3 + $0x4c] sm:$0xf]  ;;  %v1251_v38 = vld [vmem:[#allocation3 + $0x54] sm:$0xf0]  ;;  %v1578_v39 = vor.u32 %v1340_v32, %v1281_v31 }
  0x10   :  { %v1269_v40 = vld [vmem:[#allocation3 + $0x68] sm:$0xf]  ;;  %v1337_v41 = vld [vmem:[#allocation3 + $0x70] sm:$0xf0]  ;;  %v1581_v42 = vor.u32 %v1333_v36, %v1249_v35  ;;  %v1585_v43 = vor.u32 %v1332_v37, %v1251_v38  ;;  %v1237_v44 = vld [vmem:[#allocation3 + $0x30] sm:$0xf] }
  0x11   :  { %v1330_v45 = vld [vmem:[#allocation3 + $0x38] sm:$0xf0]  ;;  %v1329_v46 = vld [vmem:[#allocation3 + $0x34] sm:$0xf]  ;;  %v1239_v47 = vld [vmem:[#allocation3 + $0x3c] sm:$0xf0]  ;;  %v1588_v48 = vor.u32 %v1337_v41, %v1269_v40 }
  0x12   :  { %397 = vmatpush.bf16.msra.mxu0 %v1556_v20  ;;  %492 = vmatpush.bf16.msra.mxu3 %v1556_v20  ;;  %v52_v49 = vld [vmem:[%s1992_s0 + $0xc] sm:$0x3]  ;;  %v1257_v50 = vld [vmem:[#allocation3 + $0x50] sm:$0xf]  ;;  %v1594_v52 = vor.u32 %v1330_v45, %v1237_v44  ;;  %v1598_v53 = vor.u32 %v1329_v46, %v1239_v47  ;;  %v1225_v54 = vld [vmem:[#allocation3 + $0x18] sm:$0xf] }
  0x13   :  { %410 = vmatpush.bf16.msra.mxu1 %v1562_v23  ;;  %61 = vperm.xlu0 %1352, %v47_v30   ;;  %v1334_v51 = vld [vmem:[#allocation3 + $0x58] sm:$0xf0]  ;;  %v1327_v55 = vld [vmem:[#allocation3 + $0x20] sm:$0xf0]  ;;  %v1227_v57 = vld [vmem:[#allocation3 + $0x24] sm:$0xf0] }
  0x14   :  { %422 = vmatpush.bf16.msra.mxu2 %v1565_v29  ;;  %v1326_v56 = vld [vmem:[#allocation3 + $0x1c] sm:$0xf]  ;;  %v1601_v58 = vor.u32 %v1334_v51, %v1257_v50  ;;  %v1245_v59 = vld [vmem:[#allocation3 + $0x38] sm:$0xf]  ;;  %v1331_v60 = vld [vmem:[#allocation3 + $0x40] sm:$0xf0]  ;;  %v1604_v61 = vor.u32 %v1327_v55, %v1225_v54 }
  0x15   :  { %v1608_v62 = vor.u32 %v1326_v56, %v1227_v57  ;;  %v1213_v63 = vld [vmem:[#allocation3] sm:$0xf]  ;;  %v1324_v1 = vld [vmem:[#allocation3 + $0x8] sm:$0xf0]  ;;  %v1323_v2 = vld [vmem:[#allocation3 + $0x4] sm:$0xf]  ;;  %v1611_v5 = vor.u32 %v1331_v60, %v1245_v59 }
  0x16   :  { %398 = vmatpush.bf16.msra.mxu0 %v1571_v33  ;;  %493 = vmatpush.bf16.msra.mxu3 %v1571_v33  ;;  %v1215_v3 = vld [vmem:[#allocation3 + $0xc] sm:$0xf0]  ;;  %v1233_v6 = vld [vmem:[#allocation3 + $0x20] sm:$0xf]  ;;  %v1328_v7 = vld [vmem:[#allocation3 + $0x28] sm:$0xf0]  ;;  %v1614_v9 = vor.u32 %v1324_v1, %v1213_v63 }
  0x17   :  { %411 = vmatpush.bf16.msra.mxu1 %v1575_v34  ;;  %v1618_v10 = vor.u32 %v1323_v2, %v1215_v3  ;;  %v1621_v13 = vor.u32 %v1328_v7, %v1233_v6  ;;  %v1221_v14 = vld [vmem:[#allocation3 + $0x8] sm:$0xf]  ;;  %v1325_v15 = vld [vmem:[#allocation3 + $0x10] sm:$0xf0]  ;;  %v45_v17 = vld [vmem:[%s1994_s2] sm:$0x7] }
  0x18   :  { %423 = vmatpush.bf16.msra.mxu2 %v1578_v39  ;;  %v1628_v16 = vor.u32 %v1325_v15, %v1221_v14  ;;  %v1701_v24 = vperm.slane %v45_v17, 0  ;;  %v1703_v25 = vperm.slane %v45_v17, 1  ;;  %v1705_v26 = vperm.slane %v45_v17, 2  ;;  %s1494_s8 = smov [#allocation6]   ;;  %s1201_s12 = sshll.u32 %s1999_s7, 4  ;;  %s1202_s12 = int_to_ptr.hbm [resolvable:$true] %s1201_s12 }
  0x19   :  { %vm198_vm1 = vcmask 1043456   ;;  %s1199_s9 = sshll.u32 %s1494_s8, 4  ;;  %s1200_s9 = int_to_ptr.vmem [resolvable:$true] %s1199_s9 }
  0x1a   :  { %399 = vmatpush.bf16.msra.mxu0 %v1581_v42  ;;  %494 = vmatpush.bf16.msra.mxu3 %v1581_v42 }
  0x1b   :  { %412 = vmatpush.bf16.msra.mxu1 %v1585_v43  ;;  %86 = vperm.xlu0 %1352, %v52_v49  }
  0x1c   :  { %424 = vmatpush.bf16.msra.mxu2 %v1588_v48 }
  0x1e   :  { %400 = vmatpush.bf16.msra.mxu0 %v1594_v52  ;;  %495 = vmatpush.bf16.msra.mxu3 %v1594_v52 }
  0x1f   :  { %413 = vmatpush.bf16.msra.mxu1 %v1598_v53 }
  0x20   :  { %425 = vmatpush.bf16.msra.mxu2 %v1601_v58 }
  0x22   :  { %401 = vmatpush.bf16.msra.mxu0 %v1604_v61  ;;  %496 = vmatpush.bf16.msra.mxu3 %v1604_v61 }
  0x23   :  { %414 = vmatpush.bf16.msra.mxu1 %v1608_v62 }
  0x24   :  { %426 = vmatpush.bf16.msra.mxu2 %v1611_v5 }
  0x26   :  { %402 = vmatpush.bf16.msra.mxu0 %v1614_v9  ;;  %497 = vmatpush.bf16.msra.mxu3 %v1614_v9 }
  0x27   :  { %415 = vmatpush.bf16.msra.mxu1 %v1618_v10 }
  0x28   :  { %427 = vmatpush.bf16.msra.mxu2 %v1621_v13 }
  0x29   :  { %403 = vmatmul.bf16.vlgmr.msra.gmra.mxu0 %v1493_v0 }
  0x2a   :  { %503 = vmatpush.bf16.msrb.mxu0 %v1543_v8  ;;  %598 = vmatpush.bf16.msrb.mxu3 %v1543_v8 }
  0x2b   :  { %516 = vmatpush.bf16.msrb.mxu1 %v1558_v22 }
  0x2c   :  { %416 = vmatmul.bf16.vlgmr.msra.gmra.mxu1 %v1493_v0  ;;  %428 = vmatpush.bf16.msra.mxu2 %v1628_v16 }
  0x2e   :  { %504 = vmatpush.bf16.msrb.mxu0 %v1550_v12  ;;  %599 = vmatpush.bf16.msrb.mxu3 %v1550_v12 }
  0x2f   :  { %517 = vmatpush.bf16.msrb.mxu1 %v1565_v29  ;;  %429 = vmatmul.bf16.vlgmr.msra.gmra.mxu2 %v1493_v0  ;;  %v44_v0 = vld [vmem:[%s1993_s1] sm:$0x7] }
  0x30   :  { %585 = vmatpush.bf16.msrb.mxu2 %v1541_v4  ;;  %v1695_v18 = vperm.slane %v44_v0, 0  ;;  %v1697_v19 = vperm.slane %v44_v0, 1  ;;  %v1699_v21 = vperm.slane %v44_v0, 2 }
  0x32   :  { %505 = vmatpush.bf16.msrb.mxu0 %v1562_v23  ;;  %600 = vmatpush.bf16.msrb.mxu3 %v1562_v23 }
  0x33   :  { %518 = vmatpush.bf16.msrb.mxu1 %v1578_v39 }
  0x34   :  { %586 = vmatpush.bf16.msrb.mxu2 %v1546_v11 }
  0x36   :  { %506 = vmatpush.bf16.msrb.mxu0 %v1575_v34  ;;  %601 = vmatpush.bf16.msrb.mxu3 %v1575_v34 }
  0x37   :  { %519 = vmatpush.bf16.msrb.mxu1 %v1588_v48 }
  0x38   :  { %587 = vmatpush.bf16.msrb.mxu2 %v1556_v20 }
  0x3a   :  { %507 = vmatpush.bf16.msrb.mxu0 %v1585_v43  ;;  %602 = vmatpush.bf16.msrb.mxu3 %v1585_v43 }
  0x3b   :  { %520 = vmatpush.bf16.msrb.mxu1 %v1601_v58 }
  0x3c   :  { %588 = vmatpush.bf16.msrb.mxu2 %v1571_v33 }
  0x3e   :  { %508 = vmatpush.bf16.msrb.mxu0 %v1598_v53  ;;  %603 = vmatpush.bf16.msrb.mxu3 %v1598_v53 }
  0x3f   :  { %521 = vmatpush.bf16.msrb.mxu1 %v1611_v5 }
  0x40   :  { %589 = vmatpush.bf16.msrb.mxu2 %v1581_v42 }
  0x42   :  { %509 = vmatpush.bf16.msrb.mxu0 %v1608_v62  ;;  %604 = vmatpush.bf16.msrb.mxu3 %v1608_v62 }
  0x43   :  { %522 = vmatpush.bf16.msrb.mxu1 %v1621_v13 }
  0x44   :  { %590 = vmatpush.bf16.msrb.mxu2 %v1594_v52 }
  0x46   :  { %510 = vmatpush.bf16.msrb.mxu0 %v1618_v10  ;;  %605 = vmatpush.bf16.msrb.mxu3 %v1618_v10 }
  0x47   :  { %523 = vmatpush.bf16.msrb.mxu1 %v1628_v16 }
  0x48   :  { %591 = vmatpush.bf16.msrb.mxu2 %v1604_v61 }
  0x4a   :  { %611 = vmatpush.bf16.msra.mxu0 %v1558_v22 }
  0x4b   :  { %680 = vmatpush.bf16.msra.mxu1 %v1541_v4 }
  0x4c   :  { %592 = vmatpush.bf16.msrb.mxu2 %v1614_v9 }
  0x4e   :  { %612 = vmatpush.bf16.msra.mxu0 %v1565_v29 }
  0x4f   :  { %681 = vmatpush.bf16.msra.mxu1 %v1546_v11 }
  0x50   :  { %693 = vmatpush.bf16.msra.mxu2 %v1543_v8 }
  0x52   :  { %613 = vmatpush.bf16.msra.mxu0 %v1578_v39 }
  0x53   :  { %682 = vmatpush.bf16.msra.mxu1 %v1556_v20 }
  0x54   :  { %694 = vmatpush.bf16.msra.mxu2 %v1550_v12 }
  0x56   :  { %614 = vmatpush.bf16.msra.mxu0 %v1588_v48 }
  0x57   :  { %683 = vmatpush.bf16.msra.mxu1 %v1571_v33 }
  0x58   :  { %695 = vmatpush.bf16.msra.mxu2 %v1562_v23 }
  0x5a   :  { %615 = vmatpush.bf16.msra.mxu0 %v1601_v58 }
  0x5b   :  { %684 = vmatpush.bf16.msra.mxu1 %v1581_v42 }
  0x5c   :  { %696 = vmatpush.bf16.msra.mxu2 %v1575_v34 }
  0x5e   :  { %616 = vmatpush.bf16.msra.mxu0 %v1611_v5 }
  0x5f   :  { %685 = vmatpush.bf16.msra.mxu1 %v1594_v52 }
  0x60   :  { %697 = vmatpush.bf16.msra.mxu2 %v1585_v43 }
  0x62   :  { %617 = vmatpush.bf16.msra.mxu0 %v1621_v13 }
  0x63   :  { %686 = vmatpush.bf16.msra.mxu1 %v1604_v61 }
  0x64   :  { %698 = vmatpush.bf16.msra.mxu2 %v1598_v53 }
  0x66   :  { %618 = vmatpush.bf16.msra.mxu0 %v1628_v16 }
  0x67   :  { %687 = vmatpush.bf16.msra.mxu1 %v1614_v9 }
  0x68   :  { %699 = vmatpush.bf16.msra.mxu2 %v1608_v62 }
  0x6c   :  { %700 = vmatpush.bf16.msra.mxu2 %v1618_v10 }
  0x7d   :  { %v57_v27 = vpop.permute.xlu0 %56 }
  0x7e   :  { %v101_v28 = vmul.f32 %v1695_v18, %v57_v27  ;;  %v102_v30 = vmul.f32 %v1697_v19, %v57_v27  ;;  %v103_v31 = vmul.f32 %v1699_v21, %v57_v27 }
  0x80   :  { %v132_v32 = vadd.f32 %v1701_v24, %v101_v28  ;;  %v133_v35 = vadd.f32 %v1703_v25, %v102_v30  ;;  %v134_v36 = vadd.f32 %v1705_v26, %v103_v31 }
  0x82   :  { %v180_v37 = vrot.slane %v133_v35, 6  ;;  %v181_v38 = vrot.slane %v134_v36, 4 }
  0x84   :  { %v197_v40 = vsel %vm196_vm0, %v132_v32, %v180_v37 }
  0x85   :  { %v199_v41 = vsel %vm198_vm1, %v197_v40, %v181_v38  ;;  %v62_v44 = vpop.permute.xlu0 %61 }
  0x86   :  { %222 = vst [vmem:[#allocation2] sm:$0x3f] %v199_v41  ;;  %v104_v45 = vmul.f32 %v1695_v18, %v62_v44  ;;  %v105_v46 = vmul.f32 %v1697_v19, %v62_v44  ;;  %v106_v47 = vmul.f32 %v1699_v21, %v62_v44 }
  0x88   :  { %v135_v49 = vadd.f32 %v1701_v24, %v104_v45  ;;  %v136_v50 = vadd.f32 %v1703_v25, %v105_v46  ;;  %v137_v51 = vadd.f32 %v1705_v26, %v106_v47 }
  0x8a   :  { %v182_v54 = vrot.slane %v136_v50, 6  ;;  %v183_v55 = vrot.slane %v137_v51, 4 }
  0x8c   :  { %v200_v56 = vsel %vm196_vm0, %v135_v49, %v182_v54 }
  0x8d   :  { %v201_v57 = vsel %vm198_vm1, %v200_v56, %v183_v55  ;;  %v87_v59 = vpop.permute.xlu0 %86  ;;  %v266_v17 = vld [vmem:[#allocation2] sm:$0x3f] }
  0x8e   :  { %223 = vst [vmem:[#allocation2 + $0x6] sm:$0x3f] %v201_v57  ;;  %v119_v60 = vmul.f32 %v1695_v18, %v87_v59  ;;  %v120_v63 = vmul.f32 %v1697_v19, %v87_v59  ;;  %v121_v1 = vmul.f32 %v1699_v21, %v87_v59  ;;  %v455_v27 = vrot.slane %v266_v17, 2  ;;  %v1734_v55 = vld [vmem:[%s1996_s4] ss:$0 sm:$0xff] }
  0x90   :  { %v150_v2 = vadd.f32 %v1701_v24, %v119_v60  ;;  %v151_v3 = vadd.f32 %v1703_v25, %v120_v63  ;;  %v152_v6 = vadd.f32 %v1705_v26, %v121_v1 }
  0x92   :  { %v192_v7 = vrot.slane %v151_v3, 6  ;;  %v193_v14 = vrot.slane %v152_v6, 4 }
  0x94   :  { %v210_v15 = vsel %vm196_vm0, %v150_v2, %v192_v7 }
  0x95   :  { %v211_v0 = vsel %vm198_vm1, %v210_v15, %v193_v14 }
  0x96   :  { %228 = vst [vmem:[#allocation2 + $0x24] sm:$0x3f] %v211_v0  ;;  %v479_v0 = vrot.slane %v266_v17, 4 }
  0xa6   :  { %v404_v28 = vpop.f32.mrf.mxu0 }
  0xa7   :  { %v434_v30 = vadd.f32 %v404_v28, %v266_v17 }
  0xa9   :  { %v417_v31 = vpop.f32.mrf.mxu1  ;;  %v1307_v35 = vmul.f32 -1.442695, %v434_v30 }
  0xaa   :  { %v457_v32 = vadd.f32 %v455_v27, %v417_v31 }
  0xab   :  { %1357 = vpow2.f32 %v1307_v35 }
  0xac   :  { %v1308_v36 = vmul.f32 -1.442695, %v457_v32 }
  0xae   :  { %1359 = vpow2.f32 %v1308_v36  ;;  %v406_v37 = vpop.f32.mrf.mxu0 }
  0xb1   :  { %v419_v38 = vpop.f32.mrf.mxu1  ;;  %v1358_v40 = vpop.eup %1357 }
  0xb2   :  { %v438_v44 = vadd.f32 1.0, %v1358_v40  ;;  %v430_v45 = vpop.f32.mrf.mxu2 }
  0xb3   :  { %v477_v3 = vadd.f32 %v1734_v55, %v430_v45  ;;  %v488_v45 = vld [vmem:[#allocation2 + $0x6] sm:$0x3f] }
  0xb4   :  { %v1360_v41 = vpop.eup %1359  ;;  %1361 = vrcp.f32 %v438_v44  ;;  %v450_v59 = vand.u32 2147483648, %v438_v44  ;;  %v448_v63 = vand.u32 2147483647, %v438_v44  ;;  %vm444_vm3 = vweird.f32 %v438_v44 }
  0xb5   :  { %v461_v46 = vadd.f32 1.0, %v1360_v41 }
  0xb6   :  { %v451_v6 = vor.u32 1.1754944e-38, %v450_v59  ;;  %vm449_vm5 = vcmp.eq.f32.partialorder %v448_v63, 8.507059e+37 }
  0xb7   :  { %1363 = vrcp.f32 %v461_v46  ;;  %v473_v28 = vand.u32 2147483648, %v461_v46  ;;  %vm467_vm7 = vweird.f32 %v461_v46  ;;  %v471_v30 = vand.u32 2147483647, %v461_v46 }
  0xb9   :  { %v474_v35 = vor.u32 1.1754944e-38, %v473_v28  ;;  %vm472_vm9 = vcmp.eq.f32.partialorder %v471_v30, 8.507059e+37 }
  0xba   :  { %v1362_v47 = vpop.eup %1361  ;;  %v432_v49 = vpop.f32.mrf.mxu2 }
  0xbb   :  { %v440_v51 = vmul.f32 %v1362_v47, %v438_v44  ;;  %vm445_vm2 = vweird.f32 %v1362_v47 }
  0xbc   :  { %vm446_vm4 = vmor %vm444_vm3, %vm445_vm2 }
  0xbd   :  { %v1364_v50 = vpop.eup %1363  ;;  %v441_v56 = vsub.f32 1.0, %v440_v51 }
  0xbe   :  { %v463_v54 = vmul.f32 %v1364_v50, %v461_v46  ;;  %vm468_vm6 = vweird.f32 %v1364_v50  ;;  %v550_v46 = vrot.slane %v488_v45, 2 }
  0xbf   :  { %v442_v60 = vmul.f32 %v1362_v47, %v441_v56  ;;  %vm469_vm8 = vmor %vm467_vm7, %vm468_vm6 }
  0xc0   :  { %v464_v57 = vsub.f32 1.0, %v463_v54  ;;  %v48_v54 = vld [vmem:[%s1992_s0 + $0x4] sm:$0x3] }
  0xc1   :  { %v443_v2 = vadd.f32 %v1362_v47, %v442_v60  ;;  %66 = vperm.xlu1 %1353, %v48_v54  }
  0xc2   :  { %v465_v1 = vmul.f32 %v1364_v50, %v464_v57 }
  0xc3   :  { %v447_v7 = vsel %vm446_vm4, %v1362_v47, %v443_v2 }
  0xc4   :  { %v452_v14 = vsel %vm449_vm5, %v451_v6, %v447_v7  ;;  %v466_v15 = vadd.f32 %v1364_v50, %v465_v1  ;;  %v49_v1 = vld [vmem:[%s1992_s0 + $0x6] sm:$0x3] }
  0xc5   :  { %v478_v27 = vmul.f32 %v477_v3, %v452_v14  ;;  %v53_v14 = vld [vmem:[%s1992_s0 + $0xe] sm:$0x3] }
  0xc6   :  { %v470_v32 = vsel %vm469_vm8, %v1364_v50, %v466_v15 }
  0xc7   :  { %v481_v31 = vadd.f32 %v479_v0, %v478_v27  ;;  %v475_v36 = vsel %vm472_vm9, %v474_v35, %v470_v32 }
  0xc8   :  { %v483_v37 = vsub.f32 1.0, %v475_v36  ;;  %v485_v41 = vmul.f32 0.0, %v475_v36 }
  0xc9   :  { %1365 = vtanh.f32 %v481_v31  ;;  %71 = vperm.xlu1 %1353, %v49_v1  }
  0xcf   :  { %v1366_v38 = vpop.eup %1365 }
  0xd0   :  { %v484_v40 = vmul.f32 %v1366_v38, %v483_v37 }
  0xd1   :  { %91 = vperm.xlu1 %1353, %v53_v14  }
  0xd2   :  { %v1737_v44 = vadd.f32 %v485_v41, %v484_v40 }
  0xd4   :  { %v489_v17 = vpack.c.bf16 %v1737_v44, %v1737_v44 }
  0xd6   :  { %498 = vmatmul.bf16.vlgmr.msra.gmra.mxu3 %v489_v17  ;;  %511 = vmatmul.bf16.vlgmr.msrb.gmra.mxu0 %v489_v17 }
  0xd7   :  { %524 = vmatmul.bf16.vlgmr.msrb.gmra.mxu1 %v489_v17  ;;  %706 = vmatpush.bf16.msra.mxu3 %v1558_v22 }
  0xd8   :  { %775 = vmatpush.bf16.msrb.mxu0 %v1541_v4  ;;  %788 = vmatpush.bf16.msrb.mxu1 %v1543_v8 }
  0xdb   :  { %707 = vmatpush.bf16.msra.mxu3 %v1565_v29 }
  0xdc   :  { %776 = vmatpush.bf16.msrb.mxu0 %v1546_v11  ;;  %789 = vmatpush.bf16.msrb.mxu1 %v1550_v12 }
  0xdf   :  { %708 = vmatpush.bf16.msra.mxu3 %v1578_v39 }
  0xe0   :  { %777 = vmatpush.bf16.msrb.mxu0 %v1556_v20  ;;  %790 = vmatpush.bf16.msrb.mxu1 %v1562_v23 }
  0xe3   :  { %709 = vmatpush.bf16.msra.mxu3 %v1588_v48 }
  0xe4   :  { %778 = vmatpush.bf16.msrb.mxu0 %v1571_v33  ;;  %791 = vmatpush.bf16.msrb.mxu1 %v1575_v34 }
  0xe7   :  { %710 = vmatpush.bf16.msra.mxu3 %v1601_v58 }
  0xe8   :  { %779 = vmatpush.bf16.msrb.mxu0 %v1581_v42  ;;  %792 = vmatpush.bf16.msrb.mxu1 %v1585_v43 }
  0xeb   :  { %711 = vmatpush.bf16.msra.mxu3 %v1611_v5 }
  0xec   :  { %780 = vmatpush.bf16.msrb.mxu0 %v1594_v52  ;;  %793 = vmatpush.bf16.msrb.mxu1 %v1598_v53 }
  0xef   :  { %712 = vmatpush.bf16.msra.mxu3 %v1621_v13 }
  0xf0   :  { %781 = vmatpush.bf16.msrb.mxu0 %v1604_v61  ;;  %794 = vmatpush.bf16.msrb.mxu1 %v1608_v62 }
  0xf3   :  { %713 = vmatpush.bf16.msra.mxu3 %v1628_v16 }
  0xf4   :  { %782 = vmatpush.bf16.msrb.mxu0 %v1614_v9  ;;  %795 = vmatpush.bf16.msrb.mxu1 %v1618_v10 }
 0x153   :  { %v512_v47 = vpop.f32.mrf.mxu0 }
 0x154   :  { %v552_v49 = vadd.f32 %v550_v46, %v512_v47  ;;  %v525_v50 = vpop.f32.mrf.mxu1 }
 0x155   :  { %v572_v17 = vadd.f32 %v1734_v55, %v525_v50 }
 0x156   :  { %v1310_v51 = vmul.f32 -1.442695, %v552_v49 }
 0x158   :  { %1367 = vpow2.f32 %v1310_v51  ;;  %v574_v51 = vrot.slane %v488_v45, 4 }
 0x159   :  { %v499_v56 = vpop.f32.mrf.mxu3 }
 0x15a   :  { %v529_v57 = vadd.f32 %v499_v56, %v488_v45 }
 0x15b   :  { %v514_v59 = vpop.f32.mrf.mxu0 }
 0x15c   :  { %v1309_v60 = vmul.f32 -1.442695, %v529_v57  ;;  %v527_v63 = vpop.f32.mrf.mxu1 }
 0x15e   :  { %v1368_v2 = vpop.eup %1367  ;;  %1369 = vpow2.f32 %v1309_v60 }
 0x15f   :  { %v556_v3 = vadd.f32 1.0, %v1368_v2 }
 0x161   :  { %v501_v6 = vpop.f32.mrf.mxu3  ;;  %1371 = vrcp.f32 %v556_v3  ;;  %v568_v54 = vand.u32 2147483648, %v556_v3  ;;  %vm562_vm15 = vweird.f32 %v556_v3  ;;  %v566_v57 = vand.u32 2147483647, %v556_v3 }
 0x163   :  { %v569_v63 = vor.u32 1.1754944e-38, %v568_v54  ;;  %vm567_vm3 = vcmp.eq.f32.partialorder %v566_v57, 8.507059e+37 }
 0x164   :  { %v1370_v7 = vpop.eup %1369 }
 0x165   :  { %v533_v15 = vadd.f32 1.0, %v1370_v7 }
 0x167   :  { %1373 = vrcp.f32 %v533_v15  ;;  %v1372_v0 = vpop.eup %1371  ;;  %v545_v35 = vand.u32 2147483648, %v533_v15  ;;  %v543_v37 = vand.u32 2147483647, %v533_v15  ;;  %vm539_vm11 = vweird.f32 %v533_v15 }
 0x168   :  { %v558_v27 = vmul.f32 %v1372_v0, %v556_v3  ;;  %vm563_vm14 = vweird.f32 %v1372_v0 }
 0x169   :  { %v546_v41 = vor.u32 1.1754944e-38, %v545_v35  ;;  %vm544_vm13 = vcmp.eq.f32.partialorder %v543_v37, 8.507059e+37  ;;  %vm564_vm2 = vmor %vm562_vm15, %vm563_vm14 }
 0x16a   :  { %v559_v31 = vsub.f32 1.0, %v558_v27 }
 0x16c   :  { %v560_v38 = vmul.f32 %v1372_v0, %v559_v31 }
 0x16d   :  { %v1374_v28 = vpop.eup %1373 }
 0x16e   :  { %v535_v30 = vmul.f32 %v1374_v28, %v533_v15  ;;  %vm540_vm10 = vweird.f32 %v1374_v28  ;;  %v561_v49 = vadd.f32 %v1372_v0, %v560_v38 }
 0x16f   :  { %vm541_vm12 = vmor %vm539_vm11, %vm540_vm10 }
 0x170   :  { %v536_v32 = vsub.f32 1.0, %v535_v30  ;;  %v565_v60 = vsel %vm564_vm2, %v1372_v0, %v561_v49 }
 0x171   :  { %v570_v1 = vsel %vm567_vm3, %v569_v63, %v565_v60 }
 0x172   :  { %v537_v36 = vmul.f32 %v1374_v28, %v536_v32  ;;  %v578_v2 = vsub.f32 1.0, %v570_v1  ;;  %v580_v7 = vmul.f32 %v570_v1, %v1737_v44  ;;  %v67_v44 = vpop.permute.xlu1 %66 }
 0x173   :  { %v107_v3 = vmul.f32 %v1695_v18, %v67_v44  ;;  %v108_v15 = vmul.f32 %v1697_v19, %v67_v44  ;;  %v109_v0 = vmul.f32 %v1699_v21, %v67_v44 }
 0x174   :  { %v538_v40 = vadd.f32 %v1374_v28, %v537_v36 }
 0x175   :  { %v138_v27 = vadd.f32 %v1701_v24, %v107_v3  ;;  %v140_v30 = vadd.f32 %v1705_v26, %v109_v0 }
 0x176   :  { %v542_v46 = vsel %vm541_vm12, %v1374_v28, %v538_v40  ;;  %v139_v28 = vadd.f32 %v1703_v25, %v108_v15 }
 0x177   :  { %v547_v47 = vsel %vm544_vm13, %v546_v41, %v542_v46  ;;  %v185_v32 = vrot.slane %v140_v30, 4 }
 0x178   :  { %v573_v56 = vmul.f32 %v572_v17, %v547_v47  ;;  %v184_v31 = vrot.slane %v139_v28, 6 }
 0x17a   :  { %v576_v59 = vadd.f32 %v574_v51, %v573_v56  ;;  %v202_v35 = vsel %vm196_vm0, %v138_v27, %v184_v31  ;;  %v72_v37 = vpop.permute.xlu1 %71 }
 0x17b   :  { %v203_v36 = vsel %vm198_vm1, %v202_v35, %v185_v32  ;;  %v110_v38 = vmul.f32 %v1695_v18, %v72_v37  ;;  %v111_v40 = vmul.f32 %v1697_v19, %v72_v37  ;;  %v112_v41 = vmul.f32 %v1699_v21, %v72_v37 }
 0x17c   :  { %1375 = vtanh.f32 %v576_v59  ;;  %224 = vst [vmem:[#allocation2 + $0xc] sm:$0x3f] %v203_v36 }
 0x17d   :  { %v141_v17 = vadd.f32 %v1701_v24, %v110_v38  ;;  %v142_v46 = vadd.f32 %v1703_v25, %v111_v40  ;;  %v143_v47 = vadd.f32 %v1705_v26, %v112_v41 }
 0x17f   :  { %v186_v49 = vrot.slane %v142_v46, 6  ;;  %v187_v51 = vrot.slane %v143_v47, 4 }
 0x181   :  { %v204_v54 = vsel %vm196_vm0, %v141_v17, %v186_v49 }
 0x182   :  { %v1376_v6 = vpop.eup %1375  ;;  %v205_v56 = vsel %vm198_vm1, %v204_v54, %v187_v51  ;;  %v92_v57 = vpop.permute.xlu1 %91 }
 0x183   :  { %v579_v50 = vmul.f32 %v1376_v6, %v578_v2  ;;  %225 = vst [vmem:[#allocation2 + $0x12] sm:$0x3f] %v205_v56  ;;  %v122_v59 = vmul.f32 %v1695_v18, %v92_v57  ;;  %v123_v60 = vmul.f32 %v1697_v19, %v92_v57  ;;  %v124_v63 = vmul.f32 %v1699_v21, %v92_v57  ;;  %v583_v3 = vld [vmem:[#allocation2 + $0xc] sm:$0x3f] }
 0x184   :  { %v645_v0 = vrot.slane %v583_v3, 2 }
 0x185   :  { %v1776_v14 = vadd.f32 %v580_v7, %v579_v50  ;;  %v153_v1 = vadd.f32 %v1701_v24, %v122_v59  ;;  %v154_v2 = vadd.f32 %v1703_v25, %v123_v60  ;;  %v155_v6 = vadd.f32 %v1705_v26, %v124_v63 }
 0x187   :  { %v584_v45 = vpack.c.bf16 %v1776_v14, %v1776_v14  ;;  %v194_v50 = vrot.slane %v154_v2, 6  ;;  %v195_v7 = vrot.slane %v155_v6, 4 }
 0x189   :  { %593 = vmatmul.bf16.vlgmr.msrb.gmra.mxu2 %v584_v45  ;;  %606 = vmatmul.bf16.vlgmr.msrb.gmra.mxu3 %v584_v45 }
 0x18a   :  { %619 = vmatmul.bf16.vlgmr.msra.gmra.mxu0 %v584_v45  ;;  %801 = vmatpush.bf16.msrb.mxu2 %v1558_v22  ;;  %v212_v45 = vsel %vm196_vm0, %v153_v1, %v194_v50 }
 0x18b   :  { %870 = vmatpush.bf16.msrb.mxu3 %v1541_v4  ;;  %883 = vmatpush.bf16.msra.mxu0 %v1543_v8  ;;  %v213_v44 = vsel %vm198_vm1, %v212_v45, %v195_v7 }
 0x18c   :  { %229 = vst [vmem:[#allocation2 + $0x2a] sm:$0x3f] %v213_v44 }
 0x18e   :  { %802 = vmatpush.bf16.msrb.mxu2 %v1565_v29 }
 0x18f   :  { %871 = vmatpush.bf16.msrb.mxu3 %v1546_v11  ;;  %884 = vmatpush.bf16.msra.mxu0 %v1550_v12 }
 0x192   :  { %803 = vmatpush.bf16.msrb.mxu2 %v1578_v39 }
 0x193   :  { %872 = vmatpush.bf16.msrb.mxu3 %v1556_v20  ;;  %885 = vmatpush.bf16.msra.mxu0 %v1562_v23 }
 0x196   :  { %804 = vmatpush.bf16.msrb.mxu2 %v1588_v48 }
 0x197   :  { %873 = vmatpush.bf16.msrb.mxu3 %v1571_v33  ;;  %886 = vmatpush.bf16.msra.mxu0 %v1575_v34 }
 0x19a   :  { %805 = vmatpush.bf16.msrb.mxu2 %v1601_v58 }
 0x19b   :  { %874 = vmatpush.bf16.msrb.mxu3 %v1581_v42  ;;  %887 = vmatpush.bf16.msra.mxu0 %v1585_v43 }
 0x19e   :  { %806 = vmatpush.bf16.msrb.mxu2 %v1611_v5 }
 0x19f   :  { %875 = vmatpush.bf16.msrb.mxu3 %v1594_v52  ;;  %888 = vmatpush.bf16.msra.mxu0 %v1598_v53 }
 0x1a2   :  { %807 = vmatpush.bf16.msrb.mxu2 %v1621_v13 }
 0x1a3   :  { %876 = vmatpush.bf16.msrb.mxu3 %v1604_v61  ;;  %889 = vmatpush.bf16.msra.mxu0 %v1608_v62 }
 0x1a6   :  { %808 = vmatpush.bf16.msrb.mxu2 %v1628_v16 }
 0x1a7   :  { %877 = vmatpush.bf16.msrb.mxu3 %v1614_v9  ;;  %890 = vmatpush.bf16.msra.mxu0 %v1618_v10 }
 0x207   :  { %v620_v15 = vpop.f32.mrf.mxu0 }
 0x208   :  { %v667_v50 = vadd.f32 %v1734_v55, %v620_v15 }
 0x20c   :  { %v594_v27 = vpop.f32.mrf.mxu2  ;;  %v607_v28 = vpop.f32.mrf.mxu3 }
 0x20d   :  { %v624_v30 = vadd.f32 %v594_v27, %v583_v3  ;;  %v647_v31 = vadd.f32 %v645_v0, %v607_v28  ;;  %v669_v27 = vrot.slane %v583_v3, 4 }
 0x20f   :  { %v1311_v32 = vmul.f32 -1.442695, %v624_v30  ;;  %v1312_v35 = vmul.f32 -1.442695, %v647_v31  ;;  %v622_v36 = vpop.f32.mrf.mxu0 }
 0x211   :  { %1377 = vpow2.f32 %v1311_v32 }
 0x212   :  { %1379 = vpow2.f32 %v1312_v35 }
 0x214   :  { %v596_v37 = vpop.f32.mrf.mxu2  ;;  %v609_v38 = vpop.f32.mrf.mxu3 }
 0x217   :  { %v1378_v40 = vpop.eup %1377 }
 0x218   :  { %v1380_v41 = vpop.eup %1379  ;;  %v628_v17 = vadd.f32 1.0, %v1378_v40 }
 0x219   :  { %v651_v46 = vadd.f32 1.0, %v1380_v41 }
 0x21a   :  { %1381 = vrcp.f32 %v628_v17  ;;  %v640_v57 = vand.u32 2147483648, %v628_v17  ;;  %v638_v63 = vand.u32 2147483647, %v628_v17  ;;  %vm634_vm5 = vweird.f32 %v628_v17 }
 0x21b   :  { %1383 = vrcp.f32 %v651_v46  ;;  %v663_v28 = vand.u32 2147483648, %v651_v46  ;;  %vm657_vm9 = vweird.f32 %v651_v46  ;;  %v661_v30 = vand.u32 2147483647, %v651_v46 }
 0x21c   :  { %v641_v6 = vor.u32 1.1754944e-38, %v640_v57  ;;  %vm639_vm7 = vcmp.eq.f32.partialorder %v638_v63, 8.507059e+37 }
 0x21d   :  { %v664_v35 = vor.u32 1.1754944e-38, %v663_v28  ;;  %vm662_vm11 = vcmp.eq.f32.partialorder %v661_v30, 8.507059e+37 }
 0x220   :  { %v1382_v47 = vpop.eup %1381 }
 0x221   :  { %v1384_v49 = vpop.eup %1383  ;;  %v630_v51 = vmul.f32 %v1382_v47, %v628_v17  ;;  %vm635_vm4 = vweird.f32 %v1382_v47 }
 0x222   :  { %v653_v54 = vmul.f32 %v1384_v49, %v651_v46  ;;  %vm636_vm6 = vmor %vm634_vm5, %vm635_vm4  ;;  %vm658_vm8 = vweird.f32 %v1384_v49 }
 0x223   :  { %v631_v56 = vsub.f32 1.0, %v630_v51  ;;  %vm659_vm10 = vmor %vm657_vm9, %vm658_vm8 }
 0x224   :  { %v654_v59 = vsub.f32 1.0, %v653_v54 }
 0x225   :  { %v632_v60 = vmul.f32 %v1382_v47, %v631_v56 }
 0x226   :  { %v655_v1 = vmul.f32 %v1384_v49, %v654_v59 }
 0x227   :  { %v633_v2 = vadd.f32 %v1382_v47, %v632_v60 }
 0x228   :  { %v656_v44 = vadd.f32 %v1384_v49, %v655_v1 }
 0x229   :  { %v637_v7 = vsel %vm636_vm6, %v1382_v47, %v633_v2 }
 0x22a   :  { %v642_v45 = vsel %vm639_vm7, %v641_v6, %v637_v7  ;;  %v660_v32 = vsel %vm659_vm10, %v1384_v49, %v656_v44 }
 0x22b   :  { %v668_v0 = vmul.f32 %v667_v50, %v642_v45  ;;  %v665_v36 = vsel %vm662_vm11, %v664_v35, %v660_v32  ;;  %v50_v50 = vld [vmem:[%s1992_s0 + $0x8] sm:$0x3] }
 0x22c   :  { %v673_v37 = vsub.f32 1.0, %v665_v36  ;;  %v675_v40 = vmul.f32 %v665_v36, %v1776_v14  ;;  %v678_v14 = vld [vmem:[#allocation2 + $0x12] sm:$0x3f]  ;;  %76 = vperm.xlu2 %1354, %v50_v50  }
 0x22d   :  { %v671_v31 = vadd.f32 %v669_v27, %v668_v0  ;;  %v740_v49 = vrot.slane %v678_v14, 2  ;;  %v51_v27 = vld [vmem:[%s1992_s0 + $0xa] sm:$0x3] }
 0x22f   :  { %1385 = vtanh.f32 %v671_v31 }
 0x234   :  { %81 = vperm.xlu2 %1354, %v51_v27  }
 0x235   :  { %v1386_v38 = vpop.eup %1385 }
 0x236   :  { %v674_v15 = vmul.f32 %v1386_v38, %v673_v37 }
 0x238   :  { %v1830_v41 = vadd.f32 %v675_v40, %v674_v15 }
 0x23a   :  { %v679_v3 = vpack.c.bf16 %v1830_v41, %v1830_v41 }
 0x23c   :  { %688 = vmatmul.bf16.vlgmr.msra.gmra.mxu1 %v679_v3  ;;  %701 = vmatmul.bf16.vlgmr.msra.gmra.mxu2 %v679_v3 }
 0x23d   :  { %714 = vmatmul.bf16.vlgmr.msra.gmra.mxu3 %v679_v3  ;;  %896 = vmatpush.bf16.msra.mxu1 %v1558_v22  ;;  %v764_v3 = vrot.slane %v678_v14, 4 }
 0x23e   :  { %965 = vmatpush.bf16.msra.mxu2 %v1541_v4  ;;  %978 = vmatpush.bf16.msra.mxu3 %v1543_v8 }
 0x241   :  { %897 = vmatpush.bf16.msra.mxu1 %v1565_v29 }
 0x242   :  { %966 = vmatpush.bf16.msra.mxu2 %v1546_v11  ;;  %979 = vmatpush.bf16.msra.mxu3 %v1550_v12 }
 0x245   :  { %898 = vmatpush.bf16.msra.mxu1 %v1578_v39 }
 0x246   :  { %967 = vmatpush.bf16.msra.mxu2 %v1556_v20  ;;  %980 = vmatpush.bf16.msra.mxu3 %v1562_v23 }
 0x249   :  { %899 = vmatpush.bf16.msra.mxu1 %v1588_v48 }
 0x24a   :  { %968 = vmatpush.bf16.msra.mxu2 %v1571_v33  ;;  %981 = vmatpush.bf16.msra.mxu3 %v1575_v34 }
 0x24d   :  { %900 = vmatpush.bf16.msra.mxu1 %v1601_v58 }
 0x24e   :  { %969 = vmatpush.bf16.msra.mxu2 %v1581_v42  ;;  %982 = vmatpush.bf16.msra.mxu3 %v1585_v43 }
 0x251   :  { %901 = vmatpush.bf16.msra.mxu1 %v1611_v5 }
 0x252   :  { %970 = vmatpush.bf16.msra.mxu2 %v1594_v52  ;;  %983 = vmatpush.bf16.msra.mxu3 %v1598_v53 }
 0x255   :  { %902 = vmatpush.bf16.msra.mxu1 %v1621_v13 }
 0x256   :  { %971 = vmatpush.bf16.msra.mxu2 %v1604_v61  ;;  %984 = vmatpush.bf16.msra.mxu3 %v1608_v62 }
 0x259   :  { %903 = vmatpush.bf16.msra.mxu1 %v1628_v16 }
 0x25a   :  { %972 = vmatpush.bf16.msra.mxu2 %v1614_v9  ;;  %985 = vmatpush.bf16.msra.mxu3 %v1618_v10 }
 0x2b9   :  { %v689_v17 = vpop.f32.mrf.mxu1 }
 0x2ba   :  { %v719_v46 = vadd.f32 %v689_v17, %v678_v14 }
 0x2bc   :  { %v1313_v47 = vmul.f32 -1.442695, %v719_v46 }
 0x2be   :  { %1387 = vpow2.f32 %v1313_v47 }
 0x2bf   :  { %v702_v51 = vpop.f32.mrf.mxu2 }
 0x2c0   :  { %v742_v54 = vadd.f32 %v740_v49, %v702_v51  ;;  %v715_v56 = vpop.f32.mrf.mxu3 }
 0x2c1   :  { %v691_v57 = vpop.f32.mrf.mxu1  ;;  %v762_v40 = vadd.f32 %v1734_v55, %v715_v56 }
 0x2c2   :  { %v1314_v59 = vmul.f32 -1.442695, %v742_v54 }
 0x2c4   :  { %v1388_v60 = vpop.eup %1387  ;;  %1389 = vpow2.f32 %v1314_v59 }
 0x2c5   :  { %v723_v63 = vadd.f32 1.0, %v1388_v60 }
 0x2c7   :  { %1391 = vrcp.f32 %v723_v63  ;;  %v704_v1 = vpop.f32.mrf.mxu2  ;;  %v735_v28 = vand.u32 2147483648, %v723_v63  ;;  %v733_v31 = vand.u32 2147483647, %v723_v63  ;;  %vm729_vm13 = vweird.f32 %v723_v63 }
 0x2c8   :  { %v717_v2 = vpop.f32.mrf.mxu3 }
 0x2c9   :  { %v736_v37 = vor.u32 1.1754944e-38, %v735_v28  ;;  %vm734_vm15 = vcmp.eq.f32.partialorder %v733_v31, 8.507059e+37 }
 0x2ca   :  { %v1390_v6 = vpop.eup %1389 }
 0x2cb   :  { %v746_v7 = vadd.f32 1.0, %v1390_v6 }
 0x2cd   :  { %v1392_v45 = vpop.eup %1391  ;;  %1393 = vrcp.f32 %v746_v7  ;;  %v758_v47 = vand.u32 2147483648, %v746_v7  ;;  %v756_v51 = vand.u32 2147483647, %v746_v7  ;;  %vm752_vm3 = vweird.f32 %v746_v7 }
 0x2ce   :  { %v725_v44 = vmul.f32 %v1392_v45, %v723_v63  ;;  %vm730_vm12 = vweird.f32 %v1392_v45 }
 0x2cf   :  { %vm731_vm14 = vmor %vm729_vm13, %vm730_vm12  ;;  %v759_v59 = vor.u32 1.1754944e-38, %v758_v47  ;;  %vm757_vm5 = vcmp.eq.f32.partialorder %v756_v51, 8.507059e+37 }
 0x2d0   :  { %v726_v0 = vsub.f32 1.0, %v725_v44 }
 0x2d2   :  { %v727_v30 = vmul.f32 %v1392_v45, %v726_v0 }
 0x2d3   :  { %v1394_v32 = vpop.eup %1393 }
 0x2d4   :  { %v748_v35 = vmul.f32 %v1394_v32, %v746_v7  ;;  %v728_v36 = vadd.f32 %v1392_v45, %v727_v30  ;;  %vm753_vm2 = vweird.f32 %v1394_v32 }
 0x2d5   :  { %vm754_vm4 = vmor %vm752_vm3, %vm753_vm2 }
 0x2d6   :  { %v749_v38 = vsub.f32 1.0, %v748_v35  ;;  %v732_v15 = vsel %vm731_vm14, %v1392_v45, %v728_v36 }
 0x2d7   :  { %v737_v17 = vsel %vm734_vm15, %v736_v37, %v732_v15 }
 0x2d8   :  { %v750_v46 = vmul.f32 %v1394_v32, %v749_v38  ;;  %v763_v49 = vmul.f32 %v762_v40, %v737_v17 }
 0x2da   :  { %v766_v54 = vadd.f32 %v764_v3, %v763_v49  ;;  %v751_v57 = vadd.f32 %v1394_v32, %v750_v46 }
 0x2dc   :  { %1395 = vtanh.f32 %v766_v54  ;;  %v755_v60 = vsel %vm754_vm4, %v1394_v32, %v751_v57 }
 0x2dd   :  { %v760_v63 = vsel %vm757_vm5, %v759_v59, %v755_v60 }
 0x2de   :  { %v768_v1 = vsub.f32 1.0, %v760_v63  ;;  %v770_v14 = vmul.f32 %v760_v63, %v1830_v41 }
 0x2e2   :  { %v1396_v2 = vpop.eup %1395 }
 0x2e3   :  { %v769_v6 = vmul.f32 %v1396_v2, %v768_v1 }
 0x2e5   :  { %v1866_v56 = vadd.f32 %v770_v14, %v769_v6 }
 0x2e7   :  { %v774_v50 = vpack.c.bf16 %v1866_v56, %v1866_v56 }
 0x2e9   :  { %783 = vmatmul.bf16.vlgmr.msrb.gmra.mxu0 %v774_v50  ;;  %796 = vmatmul.bf16.vlgmr.msrb.gmra.mxu1 %v774_v50 }
 0x2ea   :  { %809 = vmatmul.bf16.vlgmr.msrb.gmra.mxu2 %v774_v50  ;;  %991 = vmatpush.bf16.msrb.mxu0 %v1558_v22 }
 0x2eb   :  { %1060 = vmatpush.bf16.msrb.mxu1 %v1541_v4  ;;  %1073 = vmatpush.bf16.msrb.mxu2 %v1543_v8  ;;  %v77_v4 = vpop.permute.xlu2 %76 }
 0x2ec   :  { %v113_v8 = vmul.f32 %v1695_v18, %v77_v4 }
 0x2ee   :  { %992 = vmatpush.bf16.msrb.mxu0 %v1565_v29 }
 0x2ef   :  { %1061 = vmatpush.bf16.msrb.mxu1 %v1546_v11  ;;  %1074 = vmatpush.bf16.msrb.mxu2 %v1550_v12  ;;  %v114_v11 = vmul.f32 %v1697_v19, %v77_v4  ;;  %v115_v12 = vmul.f32 %v1699_v21, %v77_v4 }
 0x2f2   :  { %993 = vmatpush.bf16.msrb.mxu0 %v1578_v39 }
 0x2f3   :  { %1062 = vmatpush.bf16.msrb.mxu1 %v1556_v20  ;;  %1075 = vmatpush.bf16.msrb.mxu2 %v1562_v23  ;;  %v144_v20 = vadd.f32 %v1701_v24, %v113_v8  ;;  %v145_v23 = vadd.f32 %v1703_v25, %v114_v11 }
 0x2f6   :  { %994 = vmatpush.bf16.msrb.mxu0 %v1588_v48 }
 0x2f7   :  { %1063 = vmatpush.bf16.msrb.mxu1 %v1571_v33  ;;  %1076 = vmatpush.bf16.msrb.mxu2 %v1575_v34  ;;  %v146_v33 = vadd.f32 %v1705_v26, %v115_v12  ;;  %v188_v34 = vrot.slane %v145_v23, 6 }
 0x2fa   :  { %995 = vmatpush.bf16.msrb.mxu0 %v1601_v58 }
 0x2fb   :  { %1064 = vmatpush.bf16.msrb.mxu1 %v1581_v42  ;;  %1077 = vmatpush.bf16.msrb.mxu2 %v1585_v43  ;;  %v189_v42 = vrot.slane %v146_v33, 4  ;;  %v206_v43 = vsel %vm196_vm0, %v144_v20, %v188_v34 }
 0x2fe   :  { %996 = vmatpush.bf16.msrb.mxu0 %v1611_v5 }
 0x2ff   :  { %1065 = vmatpush.bf16.msrb.mxu1 %v1594_v52  ;;  %1078 = vmatpush.bf16.msrb.mxu2 %v1598_v53  ;;  %v207_v52 = vsel %vm198_vm1, %v206_v43, %v189_v42  ;;  %v82_v53 = vpop.permute.xlu2 %81 }
 0x300   :  { %226 = vst [vmem:[#allocation2 + $0x18] sm:$0x3f] %v207_v52 }
 0x302   :  { %997 = vmatpush.bf16.msrb.mxu0 %v1621_v13 }
 0x303   :  { %1066 = vmatpush.bf16.msrb.mxu1 %v1604_v61  ;;  %1079 = vmatpush.bf16.msrb.mxu2 %v1608_v62  ;;  %v116_v61 = vmul.f32 %v1695_v18, %v82_v53  ;;  %v117_v62 = vmul.f32 %v1697_v19, %v82_v53 }
 0x305   :  { %v148_v41 = vadd.f32 %v1703_v25, %v117_v62 }
 0x306   :  { %998 = vmatpush.bf16.msrb.mxu0 %v1628_v16 }
 0x307   :  { %1067 = vmatpush.bf16.msrb.mxu1 %v1614_v9  ;;  %1080 = vmatpush.bf16.msrb.mxu2 %v1618_v10  ;;  %v118_v9 = vmul.f32 %v1699_v21, %v82_v53  ;;  %v147_v10 = vadd.f32 %v1701_v24, %v116_v61  ;;  %v190_v45 = vrot.slane %v148_v41, 6  ;;  %v773_v28 = vld [vmem:[#allocation2 + $0x18] sm:$0x3f] }
 0x308   :  { %v835_v30 = vrot.slane %v773_v28, 2  ;;  %v859_v4 = vrot.slane %v773_v28, 4 }
 0x309   :  { %v149_v7 = vadd.f32 %v1705_v26, %v118_v9  ;;  %v208_v0 = vsel %vm196_vm0, %v147_v10, %v190_v45 }
 0x30b   :  { %v191_v44 = vrot.slane %v149_v7, 4 }
 0x30d   :  { %v209_v27 = vsel %vm198_vm1, %v208_v0, %v191_v44 }
 0x30e   :  { %227 = vst [vmem:[#allocation2 + $0x1e] sm:$0x3f] %v209_v27 }
 0x366   :  { %v784_v18 = vpop.f32.mrf.mxu0  ;;  %v797_v31 = vpop.f32.mrf.mxu1 }
 0x367   :  { %v814_v19 = vadd.f32 %v784_v18, %v773_v28  ;;  %v837_v32 = vadd.f32 %v835_v30, %v797_v31 }
 0x369   :  { %v1315_v21 = vmul.f32 -1.442695, %v814_v19  ;;  %v1316_v35 = vmul.f32 -1.442695, %v837_v32 }
 0x36b   :  { %1397 = vpow2.f32 %v1315_v21 }
 0x36c   :  { %1399 = vpow2.f32 %v1316_v35 }
 0x36d   :  { %v810_v24 = vpop.f32.mrf.mxu2 }
 0x36e   :  { %v786_v25 = vpop.f32.mrf.mxu0  ;;  %v799_v26 = vpop.f32.mrf.mxu1  ;;  %v857_v6 = vadd.f32 %v1734_v55, %v810_v24 }
 0x371   :  { %v1398_v36 = vpop.eup %1397 }
 0x372   :  { %v1400_v37 = vpop.eup %1399  ;;  %v818_v38 = vadd.f32 1.0, %v1398_v36 }
 0x373   :  { %v841_v15 = vadd.f32 1.0, %v1400_v37 }
 0x374   :  { %1401 = vrcp.f32 %v818_v38  ;;  %v830_v54 = vand.u32 2147483648, %v818_v38  ;;  %v828_v59 = vand.u32 2147483647, %v818_v38  ;;  %vm824_vm1 = vweird.f32 %v818_v38 }
 0x375   :  { %1403 = vrcp.f32 %v841_v15  ;;  %v812_v40 = vpop.f32.mrf.mxu2  ;;  %v853_v8 = vand.u32 2147483648, %v841_v15  ;;  %vm847_vm9 = vweird.f32 %v841_v15  ;;  %v851_v12 = vand.u32 2147483647, %v841_v15 }
 0x376   :  { %v831_v1 = vor.u32 1.1754944e-38, %v830_v54  ;;  %vm829_vm7 = vcmp.eq.f32.partialorder %v828_v59, 8.507059e+37 }
 0x377   :  { %v854_v33 = vor.u32 1.1754944e-38, %v853_v8  ;;  %vm852_vm11 = vcmp.eq.f32.partialorder %v851_v12, 8.507059e+37 }
 0x37a   :  { %v1402_v3 = vpop.eup %1401 }
 0x37b   :  { %v1404_v17 = vpop.eup %1403  ;;  %v820_v46 = vmul.f32 %v1402_v3, %v818_v38  ;;  %vm825_vm0 = vweird.f32 %v1402_v3 }
 0x37c   :  { %v843_v47 = vmul.f32 %v1404_v17, %v841_v15  ;;  %vm826_vm6 = vmor %vm824_vm1, %vm825_vm0  ;;  %vm848_vm8 = vweird.f32 %v1404_v17 }
 0x37d   :  { %v821_v49 = vsub.f32 1.0, %v820_v46  ;;  %vm849_vm10 = vmor %vm847_vm9, %vm848_vm8 }
 0x37e   :  { %v844_v51 = vsub.f32 1.0, %v843_v47 }
 0x37f   :  { %v822_v57 = vmul.f32 %v1402_v3, %v821_v49 }
 0x380   :  { %v845_v60 = vmul.f32 %v1404_v17, %v844_v51 }
 0x381   :  { %v823_v63 = vadd.f32 %v1402_v3, %v822_v57 }
 0x382   :  { %v846_v50 = vadd.f32 %v1404_v17, %v845_v60 }
 0x383   :  { %v827_v2 = vsel %vm826_vm6, %v1402_v3, %v823_v63 }
 0x384   :  { %v832_v14 = vsel %vm829_vm7, %v831_v1, %v827_v2  ;;  %v850_v23 = vsel %vm849_vm10, %v1404_v17, %v846_v50 }
 0x385   :  { %v858_v11 = vmul.f32 %v857_v6, %v832_v14  ;;  %v855_v34 = vsel %vm852_vm11, %v854_v33, %v850_v23  ;;  %v963_v6 = vld [vmem:[#allocation2 + $0x24] sm:$0x3f] }
 0x386   :  { %v863_v42 = vsub.f32 1.0, %v855_v34  ;;  %v865_v53 = vmul.f32 %v855_v34, %v1866_v56  ;;  %v868_v56 = vld [vmem:[#allocation2 + $0x1e] sm:$0x3f]  ;;  %v1025_v14 = vrot.slane %v963_v6, 2 }
 0x387   :  { %v861_v20 = vadd.f32 %v859_v4, %v858_v11  ;;  %v930_v9 = vrot.slane %v868_v56, 2  ;;  %v954_v3 = vrot.slane %v868_v56, 4 }
 0x389   :  { %1405 = vtanh.f32 %v861_v20 }
 0x38f   :  { %v1406_v43 = vpop.eup %1405 }
 0x390   :  { %v864_v52 = vmul.f32 %v1406_v43, %v863_v42 }
 0x392   :  { %v1912_v61 = vadd.f32 %v865_v53, %v864_v52 }
 0x394   :  { %v869_v62 = vpack.c.bf16 %v1912_v61, %v1912_v61 }
 0x396   :  { %878 = vmatmul.bf16.vlgmr.msrb.gmra.mxu3 %v869_v62  ;;  %891 = vmatmul.bf16.vlgmr.msra.gmra.mxu0 %v869_v62 }
 0x397   :  { %904 = vmatmul.bf16.vlgmr.msra.gmra.mxu1 %v869_v62  ;;  %1086 = vmatpush.bf16.msrb.mxu3 %v1558_v22 }
 0x39b   :  { %1087 = vmatpush.bf16.msrb.mxu3 %v1565_v29 }
 0x39f   :  { %1088 = vmatpush.bf16.msrb.mxu3 %v1578_v39 }
 0x3a3   :  { %1089 = vmatpush.bf16.msrb.mxu3 %v1588_v48 }
 0x3a7   :  { %1090 = vmatpush.bf16.msrb.mxu3 %v1601_v58 }
 0x3ab   :  { %1091 = vmatpush.bf16.msrb.mxu3 %v1611_v5 }
 0x3af   :  { %1092 = vmatpush.bf16.msrb.mxu3 %v1621_v13 }
 0x3b3   :  { %1093 = vmatpush.bf16.msrb.mxu3 %v1628_v16 }
 0x413   :  { %v892_v10 = vpop.f32.mrf.mxu0 }
 0x414   :  { %v932_v41 = vadd.f32 %v930_v9, %v892_v10  ;;  %v905_v7 = vpop.f32.mrf.mxu1 }
 0x415   :  { %v952_v36 = vadd.f32 %v1734_v55, %v905_v7 }
 0x416   :  { %v1318_v22 = vmul.f32 -1.442695, %v932_v41 }
 0x418   :  { %1407 = vpow2.f32 %v1318_v22 }
 0x419   :  { %v879_v29 = vpop.f32.mrf.mxu3 }
 0x41a   :  { %v909_v45 = vadd.f32 %v879_v29, %v868_v56 }
 0x41b   :  { %v894_v39 = vpop.f32.mrf.mxu0 }
 0x41c   :  { %v1317_v44 = vmul.f32 -1.442695, %v909_v45  ;;  %v907_v48 = vpop.f32.mrf.mxu1 }
 0x41d   :  { %v1929_v48 = vld [vmem:[%s1996_s4] ss:$0 sm:$0xff] }
 0x41e   :  { %v1408_v0 = vpop.eup %1407  ;;  %1409 = vpow2.f32 %v1317_v44 }
 0x41f   :  { %v936_v58 = vadd.f32 1.0, %v1408_v0 }
 0x421   :  { %v881_v5 = vpop.f32.mrf.mxu3  ;;  %1411 = vrcp.f32 %v936_v58  ;;  %v948_v40 = vand.u32 2147483648, %v936_v58  ;;  %vm942_vm3 = vweird.f32 %v936_v58  ;;  %v946_v46 = vand.u32 2147483647, %v936_v58 }
 0x423   :  { %v949_v51 = vor.u32 1.1754944e-38, %v948_v40  ;;  %vm947_vm5 = vcmp.eq.f32.partialorder %v946_v46, 8.507059e+37  ;;  %v1164_v40 = vld [vmem:[%s1997_s5 + $0x60] sm:$0xff]  ;;  %v1161_v46 = vld [vmem:[%s1997_s5 + $0x48] sm:$0xff] }
 0x424   :  { %v1410_v13 = vpop.eup %1409 }
 0x425   :  { %v913_v27 = vadd.f32 1.0, %v1410_v13 }
 0x427   :  { %1413 = vrcp.f32 %v913_v27  ;;  %v1412_v16 = vpop.eup %1411  ;;  %v925_v32 = vand.u32 2147483648, %v913_v27  ;;  %v923_v35 = vand.u32 2147483647, %v913_v27  ;;  %vm919_vm13 = vweird.f32 %v913_v27 }
 0x428   :  { %v938_v28 = vmul.f32 %v1412_v16, %v936_v58  ;;  %vm943_vm2 = vweird.f32 %v1412_v16 }
 0x429   :  { %v926_v26 = vor.u32 1.1754944e-38, %v925_v32  ;;  %vm924_vm15 = vcmp.eq.f32.partialorder %v923_v35, 8.507059e+37  ;;  %vm944_vm4 = vmor %vm942_vm3, %vm943_vm2 }
 0x42a   :  { %v939_v31 = vsub.f32 1.0, %v938_v28 }
 0x42c   :  { %v940_v24 = vmul.f32 %v1412_v16, %v939_v31 }
 0x42d   :  { %v1414_v30 = vpop.eup %1413 }
 0x42e   :  { %v915_v18 = vmul.f32 %v1414_v30, %v913_v27  ;;  %vm920_vm12 = vweird.f32 %v1414_v30  ;;  %v941_v15 = vadd.f32 %v1412_v16, %v940_v24 }
 0x42f   :  { %vm921_vm14 = vmor %vm919_vm13, %vm920_vm12 }
 0x430   :  { %v916_v19 = vsub.f32 1.0, %v915_v18  ;;  %v945_v49 = vsel %vm944_vm4, %v1412_v16, %v941_v15  ;;  %v1049_v16 = vrot.slane %v963_v6, 4  ;;  %v1165_v15 = vld [vmem:[%s1997_s5 + $0x68] sm:$0xff] }
 0x431   :  { %v950_v54 = vsel %vm947_vm5, %v949_v51, %v945_v49  ;;  %v1159_v49 = vld [vmem:[%s1997_s5 + $0x38] sm:$0xff]  ;;  %v1058_v51 = vld [vmem:[#allocation2 + $0x2a] sm:$0x3f] }
 0x432   :  { %v917_v21 = vmul.f32 %v1414_v30, %v916_v19  ;;  %v958_v57 = vsub.f32 1.0, %v950_v54  ;;  %v960_v60 = vmul.f32 %v950_v54, %v1912_v61 }
 0x434   :  { %v918_v25 = vadd.f32 %v1414_v30, %v917_v21 }
 0x436   :  { %v922_v37 = vsel %vm921_vm14, %v1414_v30, %v918_v25 }
 0x437   :  { %v927_v38 = vsel %vm924_vm15, %v926_v26, %v922_v37  ;;  %v1167_v37 = vld [vmem:[%s1997_s5 + $0x78] sm:$0xff] }
 0x438   :  { %v953_v17 = vmul.f32 %v952_v36, %v927_v38  ;;  %1172 = vmatpush.msra.mxu0 %v1167_v37  ;;  %v1166_v38 = vld [vmem:[%s1997_s5 + $0x70] sm:$0xff] }
 0x43a   :  { %v956_v47 = vadd.f32 %v954_v3, %v953_v17  ;;  %1173 = vmatpush.msra.mxu0 %v1166_v38  ;;  %v1163_v3 = vld [vmem:[%s1997_s5 + $0x58] sm:$0xff]  ;;  %v1162_v17 = vld [vmem:[%s1997_s5 + $0x50] sm:$0xff] }
 0x43c   :  { %1415 = vtanh.f32 %v956_v47  ;;  %1174 = vmatpush.msra.mxu0 %v1165_v15  ;;  %v1160_v47 = vld [vmem:[%s1997_s5 + $0x40] sm:$0xff] }
 0x43e   :  { %1175 = vmatpush.msra.mxu0 %v1164_v40 }
 0x440   :  { %1176 = vmatpush.msra.mxu0 %v1163_v3 }
 0x442   :  { %v1416_v59 = vpop.eup %1415  ;;  %1177 = vmatpush.msra.mxu0 %v1162_v17 }
 0x443   :  { %v959_v55 = vmul.f32 %v1416_v59, %v958_v57  ;;  %v1158_v59 = vld [vmem:[%s1997_s5 + $0x30] sm:$0xff] }
 0x444   :  { %1178 = vmatpush.msra.mxu0 %v1161_v46 }
 0x445   :  { %v961_v63 = vadd.f32 %v960_v60, %v959_v55  ;;  %v1157_v60 = vld [vmem:[%s1997_s5 + $0x28] sm:$0xff] }
 0x446   :  { %1179 = vmatpush.msra.mxu0 %v1160_v47 }
 0x447   :  { %v964_v1 = vpack.c.bf16 %v961_v63, %v961_v63 }
 0x448   :  { %1180 = vmatpush.msra.mxu0 %v1159_v49 }
 0x449   :  { %973 = vmatmul.bf16.vlgmr.msra.gmra.mxu2 %v964_v1  ;;  %986 = vmatmul.bf16.vlgmr.msra.gmra.mxu3 %v964_v1 }
 0x44a   :  { %999 = vmatmul.bf16.vlgmr.msrb.gmra.mxu0 %v964_v1  ;;  %v1120_v1 = vrot.slane %v1058_v51, 2 }
 0x44b   :  { %1181 = vmatpush.msra.mxu0 %v1158_v59 }
 0x44d   :  { %1182 = vmatpush.msra.mxu0 %v1157_v60 }
 0x4c7   :  { %v1000_v2 = vpop.f32.mrf.mxu0 }
 0x4c8   :  { %v1047_v0 = vadd.f32 %v1929_v48, %v1000_v2  ;;  %v1155_v2 = vld [vmem:[%s1997_s5 + $0x18] sm:$0xff] }
 0x4cc   :  { %v974_v50 = vpop.f32.mrf.mxu2  ;;  %v987_v4 = vpop.f32.mrf.mxu3 }
 0x4cd   :  { %v1004_v8 = vadd.f32 %v974_v50, %v963_v6  ;;  %v1027_v11 = vadd.f32 %v1025_v14, %v987_v4  ;;  %v1154_v4 = vld [vmem:[%s1997_s5 + $0x10] sm:$0xff] }
 0x4cf   :  { %v1319_v12 = vmul.f32 -1.442695, %v1004_v8  ;;  %v1320_v20 = vmul.f32 -1.442695, %v1027_v11  ;;  %v1002_v23 = vpop.f32.mrf.mxu0 }
 0x4d0   :  { %v1152_v23 = vld [vmem:[%s1997_s5] sm:$0xff] }
 0x4d1   :  { %1417 = vpow2.f32 %v1319_v12  ;;  %v1153_v12 = vld [vmem:[%s1997_s5 + $0x8] sm:$0xff] }
 0x4d2   :  { %1419 = vpow2.f32 %v1320_v20 }
 0x4d4   :  { %v976_v33 = vpop.f32.mrf.mxu2  ;;  %v989_v34 = vpop.f32.mrf.mxu3 }
 0x4d7   :  { %v1418_v42 = vpop.eup %1417 }
 0x4d8   :  { %v1420_v43 = vpop.eup %1419  ;;  %v1008_v52 = vadd.f32 1.0, %v1418_v42 }
 0x4d9   :  { %v1031_v53 = vadd.f32 1.0, %v1420_v43 }
 0x4da   :  { %1421 = vrcp.f32 %v1008_v52  ;;  %v1020_v41 = vand.u32 2147483648, %v1008_v52  ;;  %v1018_v29 = vand.u32 2147483647, %v1008_v52  ;;  %vm1014_vm1 = vweird.f32 %v1008_v52 }
 0x4db   :  { %1423 = vrcp.f32 %v1031_v53  ;;  %v1043_v28 = vand.u32 2147483648, %v1031_v53  ;;  %vm1037_vm9 = vweird.f32 %v1031_v53  ;;  %v1041_v30 = vand.u32 2147483647, %v1031_v53 }
 0x4dc   :  { %v1021_v44 = vor.u32 1.1754944e-38, %v1020_v41  ;;  %vm1019_vm7 = vcmp.eq.f32.partialorder %v1018_v29, 8.507059e+37 }
 0x4dd   :  { %v1044_v19 = vor.u32 1.1754944e-38, %v1043_v28  ;;  %vm1042_vm11 = vcmp.eq.f32.partialorder %v1041_v30, 8.507059e+37 }
 0x4e0   :  { %v1422_v61 = vpop.eup %1421 }
 0x4e1   :  { %v1424_v62 = vpop.eup %1423  ;;  %v1010_v56 = vmul.f32 %v1422_v61, %v1008_v52  ;;  %vm1015_vm0 = vweird.f32 %v1422_v61 }
 0x4e2   :  { %v1033_v9 = vmul.f32 %v1424_v62, %v1031_v53  ;;  %vm1016_vm6 = vmor %vm1014_vm1, %vm1015_vm0  ;;  %vm1038_vm8 = vweird.f32 %v1424_v62  ;;  %vm1192_vm0 = vcmask 123904  }
 0x4e3   :  { %v1011_v10 = vsub.f32 1.0, %v1010_v56  ;;  %vm1039_vm10 = vmor %vm1037_vm9, %vm1038_vm8 }
 0x4e4   :  { %v1034_v7 = vsub.f32 1.0, %v1033_v9 }
 0x4e5   :  { %v1012_v22 = vmul.f32 %v1422_v61, %v1011_v10 }
 0x4e6   :  { %v1035_v45 = vmul.f32 %v1424_v62, %v1034_v7 }
 0x4e7   :  { %v1013_v39 = vadd.f32 %v1422_v61, %v1012_v22 }
 0x4e8   :  { %v1036_v13 = vadd.f32 %v1424_v62, %v1035_v45 }
 0x4e9   :  { %v1017_v58 = vsel %vm1016_vm6, %v1422_v61, %v1013_v39 }
 0x4ea   :  { %v1022_v5 = vsel %vm1019_vm7, %v1021_v44, %v1017_v58  ;;  %v1040_v31 = vsel %vm1039_vm10, %v1424_v62, %v1036_v13 }
 0x4eb   :  { %v1048_v27 = vmul.f32 %v1047_v0, %v1022_v5  ;;  %v1045_v32 = vsel %vm1042_vm11, %v1044_v19, %v1040_v31  ;;  %v1144_v0 = vrot.slane %v1058_v51, 4 }
 0x4ec   :  { %v1053_v21 = vsub.f32 1.0, %v1045_v32  ;;  %v1055_v25 = vmul.f32 %v1045_v32, %v961_v63  ;;  %v1156_v63 = vld [vmem:[%s1997_s5 + $0x20] sm:$0xff] }
 0x4ed   :  { %v1051_v18 = vadd.f32 %v1049_v16, %v1048_v27  ;;  %1183 = vmatpush.msra.mxu0 %v1156_v63 }
 0x4ef   :  { %1425 = vtanh.f32 %v1051_v18  ;;  %1184 = vmatpush.msra.mxu0 %v1155_v2 }
 0x4f1   :  { %1185 = vmatpush.msra.mxu0 %v1154_v4 }
 0x4f3   :  { %1186 = vmatpush.msra.mxu0 %v1153_v12 }
 0x4f5   :  { %v1426_v35 = vpop.eup %1425  ;;  %1187 = vmatpush.msra.mxu0 %v1152_v23 }
 0x4f6   :  { %v1054_v24 = vmul.f32 %v1426_v35, %v1053_v21 }
 0x4f8   :  { %v1932_v26 = vadd.f32 %v1055_v25, %v1054_v24  ;;  %v1356_v25 = vld [vmem:[%s1998_s6] ss:$0 sm:$0xff] }
 0x4fa   :  { %v1059_v36 = vpack.c.bf16 %v1932_v26, %v1932_v26 }
 0x4fc   :  { %1068 = vmatmul.bf16.vlgmr.msrb.gmra.mxu1 %v1059_v36  ;;  %1081 = vmatmul.bf16.vlgmr.msrb.gmra.mxu2 %v1059_v36 }
 0x4fd   :  { %1094 = vmatmul.bf16.vlgmr.msrb.gmra.mxu3 %v1059_v36 }
 0x579   :  { %v1069_v54 = vpop.f32.mrf.mxu1 }
 0x57a   :  { %v1099_v57 = vadd.f32 %v1069_v54, %v1058_v51 }
 0x57c   :  { %v1321_v55 = vmul.f32 -1.442695, %v1099_v57 }
 0x57e   :  { %1427 = vpow2.f32 %v1321_v55 }
 0x57f   :  { %v1082_v6 = vpop.f32.mrf.mxu2 }
 0x580   :  { %v1122_v14 = vadd.f32 %v1120_v1, %v1082_v6  ;;  %v1095_v50 = vpop.f32.mrf.mxu3 }
 0x581   :  { %v1071_v8 = vpop.f32.mrf.mxu1  ;;  %v1142_v44 = vadd.f32 %v1929_v48, %v1095_v50 }
 0x582   :  { %v1322_v11 = vmul.f32 -1.442695, %v1122_v14 }
 0x584   :  { %v1428_v20 = vpop.eup %1427  ;;  %1429 = vpow2.f32 %v1322_v11 }
 0x585   :  { %v1103_v33 = vadd.f32 1.0, %v1428_v20 }
 0x587   :  { %1431 = vrcp.f32 %v1103_v33  ;;  %v1084_v34 = vpop.f32.mrf.mxu2  ;;  %v1115_v56 = vand.u32 2147483648, %v1103_v33  ;;  %v1113_v10 = vand.u32 2147483647, %v1103_v33  ;;  %vm1109_vm13 = vweird.f32 %v1103_v33 }
 0x588   :  { %v1097_v42 = vpop.f32.mrf.mxu3 }
 0x589   :  { %v1116_v29 = vor.u32 1.1754944e-38, %v1115_v56  ;;  %vm1114_vm15 = vcmp.eq.f32.partialorder %v1113_v10, 8.507059e+37 }
 0x58a   :  { %v1430_v43 = vpop.eup %1429 }
 0x58b   :  { %v1126_v52 = vadd.f32 1.0, %v1430_v43 }
 0x58d   :  { %v1432_v53 = vpop.eup %1431  ;;  %1433 = vrcp.f32 %v1126_v52  ;;  %v1138_v27 = vand.u32 2147483648, %v1126_v52  ;;  %v1136_v16 = vand.u32 2147483647, %v1126_v52  ;;  %vm1132_vm3 = vweird.f32 %v1126_v52 }
 0x58e   :  { %v1105_v61 = vmul.f32 %v1432_v53, %v1103_v33  ;;  %vm1110_vm12 = vweird.f32 %v1432_v53 }
 0x58f   :  { %vm1111_vm14 = vmor %vm1109_vm13, %vm1110_vm12  ;;  %v1139_v31 = vor.u32 1.1754944e-38, %v1138_v27  ;;  %vm1137_vm5 = vcmp.eq.f32.partialorder %v1136_v16, 8.507059e+37 }
 0x590   :  { %v1106_v62 = vsub.f32 1.0, %v1105_v61 }
 0x592   :  { %v1107_v9 = vmul.f32 %v1432_v53, %v1106_v62 }
 0x593   :  { %v1434_v41 = vpop.eup %1433 }
 0x594   :  { %v1128_v7 = vmul.f32 %v1434_v41, %v1126_v52  ;;  %v1108_v22 = vadd.f32 %v1432_v53, %v1107_v9  ;;  %vm1133_vm2 = vweird.f32 %v1434_v41 }
 0x595   :  { %vm1134_vm4 = vmor %vm1132_vm3, %vm1133_vm2 }
 0x596   :  { %v1129_v45 = vsub.f32 1.0, %v1128_v7  ;;  %v1112_v39 = vsel %vm1111_vm14, %v1432_v53, %v1108_v22 }
 0x597   :  { %v1117_v58 = vsel %vm1114_vm15, %v1116_v29, %v1112_v39 }
 0x598   :  { %v1130_v5 = vmul.f32 %v1434_v41, %v1129_v45  ;;  %v1143_v13 = vmul.f32 %v1142_v44, %v1117_v58 }
 0x59a   :  { %v1146_v28 = vadd.f32 %v1144_v0, %v1143_v13  ;;  %v1131_v30 = vadd.f32 %v1434_v41, %v1130_v5 }
 0x59c   :  { %1435 = vtanh.f32 %v1146_v28  ;;  %v1135_v18 = vsel %vm1134_vm4, %v1434_v41, %v1131_v30 }
 0x59d   :  { %v1140_v19 = vsel %vm1137_vm5, %v1139_v31, %v1135_v18 }
 0x59e   :  { %v1148_v32 = vsub.f32 1.0, %v1140_v19  ;;  %v1150_v48 = vmul.f32 %v1140_v19, %v1932_v26 }
 0x5a2   :  { %v1436_v21 = vpop.eup %1435 }
 0x5a3   :  { %v1149_v35 = vmul.f32 %v1436_v21, %v1148_v32 }
 0x5a5   :  { %v1151_v24 = vadd.f32 %v1150_v48, %v1149_v35 }
 0x5a7   :  { %1188 = vmatmul.f32.vlgmr.msra.gmra.mxu0 %v1151_v24 }
 0x624   :  { %v1189_v36 = vpop.f32.mrf.mxu0 }
 0x625   :  { %v1190_v37 = vadd.f32 %v1356_v25, %v1189_v36 }
 0x627   :  { %1193 = vst.msk [vmem:[#allocation6] sm:$0x3] %vm1192_vm0, %v1190_v37 }
 0x628   :  { %1204 = dma.vmem_to_hbm [thread:$0]  %s1200_s9, 32, %s1202_s12, [#allocation5]  }
 0x629   :  { %1488 = dma.done.wait [#allocation5], 32  }
 0x62a   :  { %1489 = vsyncadd [#allocation5], 4294967264 }
 0x62b   :  { %1209 = vsyncpa [#allocation4], 1 }
 0x62c   :  { %1210 = vsyncpa [#allocation5], 1 }

</bundles_post_ra>
